<compile_context>
chip_gen: v5e
topology: v5e:2x2
jax: 0.10.0
libtpu: 0.0.40
codegen_flags: <defaults>
</compile_context>

<pallas_src>
import jax
import jax.numpy as jnp
import numpy as np
from jax.experimental import pallas as pl
from jax.experimental.pallas import tpu as pltpu

_LEAD = 8   # zero rows in front of the flat h buffer (serves as left padding)
_TAIL = 8   # zero rows behind it (keeps shifted tap windows in range)


def _round_up(x, m):
    return ((x + m - 1) // m) * m


# ----------------------------------------------------------------------------
# Fused ResBlock kernel: one (batch, row-strip) tile per grid step.
# ----------------------------------------------------------------------------
def _make_resblock_kernel(th, w, wpe, group_rows):
    """th: output rows per strip, w: image width, wpe: h-buffer row stride
    (multiple of 8, >= w+1), group_rows: output rows per register accumulator."""
    thp = th + 2  # window rows (strip rows + 1-row halo on each side)

    def kernel(x_ref, halo_ref, w1_ref, b1_ref, w2_ref, b2_ref, o_ref, hbuf_ref):
        r = pl.program_id(1)
        nr = pl.num_programs(1)

        # Scratch persists across grid steps: re-zero it every strip so the
        # padding ring (lead rows, tail rows, columns >= w) reads as exact
        # zeros for conv2.  Single splat VMEM store -- cheap.
        hbuf_ref[...] = jnp.zeros(hbuf_ref.shape, hbuf_ref.dtype)

        w1 = w1_ref[...]
        b1 = b1_ref[...]
        b2 = b2_ref[...]

        def conv1_row(row_bf16):               # (w, cin) -> (w, cmid) bf16
            h = jnp.dot(row_bf16, w1, preferred_element_type=jnp.float32)
            h = h + b1
            h = jnp.where(h >= 0.0, h, 0.1 * h)        # LeakyReLU(0.1)
            return h.astype(hbuf_ref.dtype)

        # conv1 on the halo rows -- only when they are real image rows.
        @pl.when(r > 0)
        def _():
            hbuf_ref[pl.ds(_LEAD, w), :] = conv1_row(halo_ref[0, 0])

        @pl.when(r < nr - 1)
        def _():
            hbuf_ref[pl.ds(_LEAD + (thp - 1) * wpe, w), :] = conv1_row(
                halo_ref[0, 1])

        # conv1 on the strip's own rows (interior columns only; the zero ring
        # of hbuf is never written).  Stores are sublane-aligned (wpe % 8 == 0).
        for y in range(th):
            hbuf_ref[pl.ds(_LEAD + (y + 1) * wpe, w), :] = conv1_row(x_ref[0, y])

        # conv2 (3x3, pad=1) as 9 shifted flat windows, accumulated in
        # registers per row group, then +bias, LeakyReLU, +residual and
        # lane-dense per-row stores (garbage columns are sliced off in regs).
        for g0 in range(0, th, group_rows):
            gr = min(group_rows, th - g0)
            rows = gr * wpe
            acc = None
            for t in range(9):
                dy, dx = divmod(t, 3)
                start = _LEAD + (g0 + dy) * wpe + dx - 1
                patch = hbuf_ref[pl.ds(start, rows), :]
                part = jnp.dot(patch, w2_ref[t],
                               preferred_element_type=jnp.float32)
                acc = part if acc is None else acc + part
            acc = acc + b2
            acc = jnp.where(acc >= 0.0, acc, 0.1 * acc)
            for y in range(gr):
                res = x_ref[0, g0 + y].astype(jnp.float32)   # bf16 residual
                o_ref[0, g0 + y, :, :] = acc[y * wpe:y * wpe + w, :] + res

    return kernel


# ----------------------------------------------------------------------------
# Tiling choice.
# ----------------------------------------------------------------------------
def _choose_tile_rows(batch, height, width, cin, cmid, cout,
                      budget_bytes=8 * 1024 * 1024, max_rows=64):
    """Largest divisor of `height` (<= max_rows) whose per-strip VMEM working
    set fits the budget; keeps >= 2 grid steps when batch == 1 (megacore)."""
    # TODO(synk): ragged last strip (prime heights such as 13) is not
    #             supported; such maps fall back to th == height or th == 1.
    wpe = _round_up(width + 1, 8)

    def strip_bytes(th):
        main_in = 2 * th * width * cin * 2           # double-buffered bf16 strip
        halo_in = 2 * 2 * width * cin * 2
        out_tile = 2 * th * width * cout * 4
        hbuf = (_LEAD + (th + 2) * wpe + _TAIL) * cmid * 2
        weights = 2 * ((cin * cmid + 9 * cmid * cout) * 2 + (cmid + cout) * 4)
        live = min(th, max(1, (48 * 1024) // max(1, wpe * cout))) * wpe * cout * 4
        return main_in + halo_in + out_tile + hbuf + weights + live + 256 * 1024

    divisors = [d for d in range(1, height + 1)
                if height % d == 0 and d <= max_rows]
    fits = [d for d in sorted(divisors, reverse=True)
            if strip_bytes(d) <= budget_bytes]
    if not fits:
        return 1
    th = fits[0]
    if batch == 1 and th == height:
        smaller = [d for d in fits if d < height]
        if smaller:
            th = smaller[0]
    return th


# ----------------------------------------------------------------------------
# Wrapper: prologue, halo side-input, pallas_call.
# ----------------------------------------------------------------------------
def res_block_forward(x_nchw, params, tile_rows=None):
    """Darknet ResBlock forward.  Input/output are PyTorch-style NCHW f32."""
    w1, b1, w2, b2 = params["w1"], params["b1"], params["w2"], params["b2"]
    cmid = w1.shape[1]
    n, cin, height, width = x_nchw.shape
    cout = w2.shape[2]
    assert cout == cin, "ResBlock requires conv2 out_channels == in_channels"

    # Single prologue pass: NCHW -> NHWC and f32 -> bf16.
    x = jnp.transpose(x_nchw, (0, 2, 3, 1)).astype(jnp.bfloat16)

    th = tile_rows if tile_rows is not None else _choose_tile_rows(
        n, height, width, cin, cmid, cout)
    assert height % th == 0, "tile_rows must divide the feature-map height"
    nr = height // th
    wpe = _round_up(width + 1, 8)
    group_rows = max(1, min(th, (48 * 1024) // max(1, wpe * cout)))

    # Halo side input: 2 rows per strip (top = row r*th-1, bottom = (r+1)*th),
    # zeros outside the image.  ~2/th of the input instead of duplicating
    # whole (th+2)-row windows in HBM.
    zrow = jnp.zeros((n, 1, width, cin), x.dtype)
    if nr > 1:
        top = jnp.concatenate([zrow, x[:, th - 1:(nr - 1) * th:th]], axis=1)
        bot = jnp.concatenate([x[:, th:height:th], zrow], axis=1)
    else:
        top, bot = zrow, zrow
    halo = jnp.stack([top, bot], axis=2).reshape(n, nr * 2, width, cin)

    kernel = _make_resblock_kernel(th, width, wpe, group_rows)

    flops = int(n * nr * ((th + 2) * width * cin * cmid * 2
                          + 9 * th * wpe * cmid * cout * 2))
    bytes_accessed = int(x.size * 2 + halo.size * 2
                         + n * height * width * cout * 4
                         + n * nr * (w1.size * 2 + w2.size * 2
                                     + (b1.size + b2.size) * 4))

    out = pl.pallas_call(
        kernel,
        out_shape=jax.ShapeDtypeStruct((n, height, width, cout), jnp.float32),
        grid_spec=pltpu.PrefetchScalarGridSpec(
            num_scalar_prefetch=0,
            grid=(n, nr),
            in_specs=[
                pl.BlockSpec((1, th, width, cin), lambda b, r: (b, r, 0, 0)),
                pl.BlockSpec((1, 2, width, cin), lambda b, r: (b, r, 0, 0)),
                pl.BlockSpec((cin, cmid), lambda b, r: (0, 0)),
                pl.BlockSpec((1, cmid), lambda b, r: (0, 0)),
                pl.BlockSpec((9, cmid, cout), lambda b, r: (0, 0, 0)),
                pl.BlockSpec((1, cout), lambda b, r: (0, 0)),
            ],
            out_specs=pl.BlockSpec((1, th, width, cout),
                                   lambda b, r: (b, r, 0, 0)),
            scratch_shapes=[
                pltpu.VMEM((_LEAD + (th + 2) * wpe + _TAIL, cmid),
                           jnp.bfloat16),
            ],
        ),
        compiler_params=pltpu.CompilerParams(
            dimension_semantics=("parallel", "parallel"),
            vmem_limit_bytes=48 * 1024 * 1024,
        ),
        cost_estimate=pl.CostEstimate(
            flops=flops, transcendentals=0, bytes_accessed=bytes_accessed),
    )(x, halo, w1, b1, w2, b2)

    return jnp.transpose(out, (0, 3, 1, 2))                      # NHWC -> NCHW


# ----------------------------------------------------------------------------
# Deterministic synthetic parameters: ConvModule = Conv(no bias) + BN +
# LeakyReLU, with inference-form BN folded into the conv weights.
# ----------------------------------------------------------------------------
def make_convmodule_params(key, k, cin, cout):
    kw, kg, kb, km, kv = jax.random.split(key, 5)
    wgt = 0.1 * jax.random.normal(kw, (k, k, cin, cout), jnp.float32)   # HWIO
    gamma = jax.random.uniform(kg, (cout,), jnp.float32, 0.5, 1.5)
    beta = 0.1 * jax.random.normal(kb, (cout,), jnp.float32)
    mean = 0.1 * jax.random.normal(km, (cout,), jnp.float32)
    var = jax.random.uniform(kv, (cout,), jnp.float32, 0.5, 1.5)
    scale = gamma / jnp.sqrt(var + 1e-5)
    bias = beta - mean * scale
    return {"w": wgt, "scale": scale, "bias": bias}


def init_resblock_params(key, in_channels, yolo_version="v3"):
    if yolo_version == "v3":
        assert in_channels % 2 == 0
        mid = in_channels // 2
    elif yolo_version == "v4":
        mid = in_channels
    else:
        raise NotImplementedError("Only YOLO v3 and v4 are supported.")
    k1, k2 = jax.random.split(key)
    c1 = make_convmodule_params(k1, 1, in_channels, mid)
    c2 = make_convmodule_params(k2, 3, mid, in_channels)
    w1f = (c1["w"].reshape(in_channels, mid)
           * c1["scale"][None, :]).astype(jnp.bfloat16)
    w2f = (c2["w"] * c2["scale"][None, None, None, :]
           ).reshape(9, mid, in_channels).astype(jnp.bfloat16)
    return {
        "w1": w1f, "b1": c1["bias"].reshape(1, mid).astype(jnp.float32),
        "w2": w2f, "b2": c2["bias"].reshape(1, in_channels).astype(jnp.float32),
        "raw": {"conv1": c1, "conv2": c2},
    }


# ----------------------------------------------------------------------------
# Pure-JAX (lax.conv, f32) reference for correctness checking.
# ----------------------------------------------------------------------------
def _ref_convmodule(x, p, stride, pad):
    y = jax.lax.conv_general_dilated(
        x, p["w"], (stride, stride), [(pad, pad), (pad, pad)],
        dimension_numbers=("NHWC", "HWIO", "NHWC"))
    y = y * p["scale"] + p["bias"]
    return jnp.where(y >= 0.0, y, 0.1 * y)


def ref_res_block(x_nchw, params):
    x = jnp.transpose(x_nchw, (0, 2, 3, 1))
    h = _ref_convmodule(x, params["raw"]["conv1"], 1, 0)
    y = _ref_convmodule(h, params["raw"]["conv2"], 1, 1)
    return jnp.transpose(y + x, (0, 3, 1, 2))


if __name__ == "__main__":
    batch, in_channels, spatial = 2, 16, 16

    key = jax.random.PRNGKey(0)
    kx, kp = jax.random.split(key)
    x = jax.random.normal(kx, (batch, in_channels, spatial, spatial), jnp.float32)
    params = init_resblock_params(kp, in_channels, yolo_version="v3")

    ref = jax.block_until_ready(ref_res_block(x, params))

    # Multi-strip path (exercises the halo rows and boundary handling, nr=2).
    fwd_striped = jax.jit(lambda t: res_block_forward(t, params, tile_rows=8))
    out = jax.block_until_ready(fwd_striped(x))
    assert out.shape == x.shape
    # bf16 matmul operands + bf16 residual with f32 accumulation -> loosened
    # tolerance versus the all-f32 reference.
    np.testing.assert_allclose(np.asarray(out), np.asarray(ref),
                               rtol=5e-2, atol=5e-2)

    # Auto-chosen tile (single strip here) must match as well.
    fwd_auto = jax.jit(lambda t: res_block_forward(t, params))
    out_auto = jax.block_until_ready(fwd_auto(x))
    np.testing.assert_allclose(np.asarray(out_auto), np.asarray(ref),
                               rtol=5e-2, atol=5e-2)

    print("KERNEL_OK")
</pallas_src>

<mosaic_0001>
module attributes {stable_mosaic.version = 11 : i64} {
  func.func @kernel(%arg0: i32, %arg1: i32, %arg2: memref<1x8x16x16xbf16, #tpu.memory_space<vmem>>, %arg3: memref<1x2x16x16xbf16, #tpu.memory_space<vmem>>, %arg4: memref<16x8xbf16, #tpu.memory_space<vmem>>, %arg5: memref<1x8xf32, #tpu.memory_space<vmem>>, %arg6: memref<9x8x16xbf16, #tpu.memory_space<vmem>>, %arg7: memref<1x16xf32, #tpu.memory_space<vmem>>, %arg8: memref<1x8x16x16xf32, #tpu.memory_space<vmem>>, %arg9: memref<256x8xbf16, #tpu.memory_space<vmem>>) attributes {dimension_semantics = [#tpu.dimension_semantics<parallel>, #tpu.dimension_semantics<parallel>], iteration_bounds = array<i64: 2, 2>, scalar_prefetch = 0 : i64, scratch_operands = 1 : i64, tpu.core_type = #tpu.core_type<tc>, window_params = [{transform_indices = @transform_0, window_bounds = array<i64: 1, 8, 16, 16>}, {transform_indices = @transform_1, window_bounds = array<i64: 1, 2, 16, 16>}, {pipeline_mode = #tpu.pipeline_mode<synchronous>, transform_indices = @transform_2, window_bounds = array<i64: 16, 8>}, {pipeline_mode = #tpu.pipeline_mode<synchronous>, transform_indices = @transform_3, window_bounds = array<i64: 1, 8>}, {pipeline_mode = #tpu.pipeline_mode<synchronous>, transform_indices = @transform_4, window_bounds = array<i64: 9, 8, 16>}, {pipeline_mode = #tpu.pipeline_mode<synchronous>, transform_indices = @transform_5, window_bounds = array<i64: 1, 16>}, {transform_indices = @transform_6, window_bounds = array<i64: 1, 8, 16, 16>}]} {
    %cst = arith.constant 0.000000e+00 : bf16
    %0 = vector.broadcast %cst : bf16 to vector<256x8xbf16>
    %c0 = arith.constant 0 : index
    %c0_0 = arith.constant 0 : index
    %1 = vector.load %arg9[%c0, %c0_0] : memref<256x8xbf16, #tpu.memory_space<vmem>>, vector<256x8xbf16>
    tpu.vector_store %arg9[%c0, %c0_0], %0 {strides = array<i32>} : memref<256x8xbf16, #tpu.memory_space<vmem>>, vector<256x8xbf16>,
    %c0_1 = arith.constant 0 : index
    %c0_2 = arith.constant 0 : index
    %2 = vector.load %arg4[%c0_1, %c0_2] : memref<16x8xbf16, #tpu.memory_space<vmem>>, vector<16x8xbf16>
    %c0_3 = arith.constant 0 : index
    %c0_4 = arith.constant 0 : index
    %3 = vector.load %arg5[%c0_3, %c0_4] : memref<1x8xf32, #tpu.memory_space<vmem>>, vector<1x8xf32>
    %c0_5 = arith.constant 0 : index
    %c0_6 = arith.constant 0 : index
    %4 = vector.load %arg7[%c0_5, %c0_6] : memref<1x16xf32, #tpu.memory_space<vmem>>, vector<1x16xf32>
    %c0_i32 = arith.constant 0 : i32
    %5 = arith.cmpi sgt, %arg1, %c0_i32 : i32
    %6 = arith.extui %5 : i1 to i32
    %c0_i32_7 = arith.constant 0 : i32
    %7 = arith.cmpi ne, %6, %c0_i32_7 : i32
    scf.if %7 {
      %c0_180 = arith.constant 0 : index
      %c0_181 = arith.constant 0 : index
      %c0_182 = arith.constant 0 : index
      %c0_183 = arith.constant 0 : index
      %222 = vector.load %arg3[%c0_180, %c0_181, %c0_182, %c0_183] : memref<1x2x16x16xbf16, #tpu.memory_space<vmem>>, vector<1x1x16x16xbf16>
      %223 = vector.shape_cast %222 : vector<1x1x16x16xbf16> to vector<16x16xbf16>
      %cst_184 = arith.constant dense<0.000000e+00> : vector<16x8xf32>
      %224 = tpu.matmul %223, %2, %cst_184 {dimension_numbers = #tpu.dot_dimension_numbers<[1], [0], [0], [1], [0, 0, 1, 1], [], []>} : vector<16x16xbf16>, vector<16x8xbf16>, vector<16x8xf32> -> vector<16x8xf32>
      %225 = vector.broadcast %3 : vector<1x8xf32> to vector<16x8xf32>
      %226 = arith.addf %224, %225 : vector<16x8xf32>
      %cst_185 = arith.constant 0.000000e+00 : f32
      %227 = vector.broadcast %cst_185 : f32 to vector<16x8xf32>
      %228 = arith.cmpf oge, %226, %227 : vector<16x8xf32>
      %cst_186 = arith.constant 1.000000e-01 : f32
      %229 = vector.broadcast %cst_186 : f32 to vector<16x8xf32>
      %230 = arith.mulf %229, %226 : vector<16x8xf32>
      %231 = arith.select %228, %226, %230 : vector<16x8xi1>, vector<16x8xf32>
      %232 = arith.truncf %231 : vector<16x8xf32> to vector<16x8xbf16>
      %c8_187 = arith.constant 8 : index
      %c0_188 = arith.constant 0 : index
      %233 = vector.load %arg9[%c8_187, %c0_188] : memref<256x8xbf16, #tpu.memory_space<vmem>>, vector<16x8xbf16>
      tpu.vector_store %arg9[%c8_187, %c0_188], %232 {strides = array<i32>} : memref<256x8xbf16, #tpu.memory_space<vmem>>, vector<16x8xbf16>,
    } else {
    }
    %c1_i32 = arith.constant 1 : i32
    %8 = arith.cmpi slt, %arg1, %c1_i32 : i32
    %9 = arith.extui %8 : i1 to i32
    %c0_i32_8 = arith.constant 0 : i32
    %10 = arith.cmpi ne, %9, %c0_i32_8 : i32
    scf.if %10 {
      %c0_180 = arith.constant 0 : index
      %c1_181 = arith.constant 1 : index
      %c0_182 = arith.constant 0 : index
      %c0_183 = arith.constant 0 : index
      %222 = vector.load %arg3[%c0_180, %c1_181, %c0_182, %c0_183] : memref<1x2x16x16xbf16, #tpu.memory_space<vmem>>, vector<1x1x16x16xbf16>
      %223 = vector.shape_cast %222 : vector<1x1x16x16xbf16> to vector<16x16xbf16>
      %cst_184 = arith.constant dense<0.000000e+00> : vector<16x8xf32>
      %224 = tpu.matmul %223, %2, %cst_184 {dimension_numbers = #tpu.dot_dimension_numbers<[1], [0], [0], [1], [0, 0, 1, 1], [], []>} : vector<16x16xbf16>, vector<16x8xbf16>, vector<16x8xf32> -> vector<16x8xf32>
      %225 = vector.broadcast %3 : vector<1x8xf32> to vector<16x8xf32>
      %226 = arith.addf %224, %225 : vector<16x8xf32>
      %cst_185 = arith.constant 0.000000e+00 : f32
      %227 = vector.broadcast %cst_185 : f32 to vector<16x8xf32>
      %228 = arith.cmpf oge, %226, %227 : vector<16x8xf32>
      %cst_186 = arith.constant 1.000000e-01 : f32
      %229 = vector.broadcast %cst_186 : f32 to vector<16x8xf32>
      %230 = arith.mulf %229, %226 : vector<16x8xf32>
      %231 = arith.select %228, %226, %230 : vector<16x8xi1>, vector<16x8xf32>
      %232 = arith.truncf %231 : vector<16x8xf32> to vector<16x8xbf16>
      %c224 = arith.constant 224 : index
      %c0_187 = arith.constant 0 : index
      %233 = vector.load %arg9[%c224, %c0_187] : memref<256x8xbf16, #tpu.memory_space<vmem>>, vector<16x8xbf16>
      tpu.vector_store %arg9[%c224, %c0_187], %232 {strides = array<i32>} : memref<256x8xbf16, #tpu.memory_space<vmem>>, vector<16x8xbf16>,
    } else {
    }
    %c0_9 = arith.constant 0 : index
    %c0_10 = arith.constant 0 : index
    %c0_11 = arith.constant 0 : index
    %c0_12 = arith.constant 0 : index
    %11 = vector.load %arg2[%c0_9, %c0_10, %c0_11, %c0_12] : memref<1x8x16x16xbf16, #tpu.memory_space<vmem>>, vector<1x1x16x16xbf16>
    %12 = vector.shape_cast %11 : vector<1x1x16x16xbf16> to vector<16x16xbf16>
    %cst_13 = arith.constant dense<0.000000e+00> : vector<16x8xf32>
    %13 = tpu.matmul %12, %2, %cst_13 {dimension_numbers = #tpu.dot_dimension_numbers<[1], [0], [0], [1], [0, 0, 1, 1], [], []>} : vector<16x16xbf16>, vector<16x8xbf16>, vector<16x8xf32> -> vector<16x8xf32>
    %14 = vector.broadcast %3 : vector<1x8xf32> to vector<16x8xf32>
    %15 = arith.addf %13, %14 : vector<16x8xf32>
    %cst_14 = arith.constant 0.000000e+00 : f32
    %16 = vector.broadcast %cst_14 : f32 to vector<16x8xf32>
    %17 = arith.cmpf oge, %15, %16 : vector<16x8xf32>
    %cst_15 = arith.constant 1.000000e-01 : f32
    %18 = vector.broadcast %cst_15 : f32 to vector<16x8xf32>
    %19 = arith.mulf %18, %15 : vector<16x8xf32>
    %20 = arith.select %17, %15, %19 : vector<16x8xi1>, vector<16x8xf32>
    %21 = arith.truncf %20 : vector<16x8xf32> to vector<16x8xbf16>
    %c32 = arith.constant 32 : index
    %c0_16 = arith.constant 0 : index
    %22 = vector.load %arg9[%c32, %c0_16] : memref<256x8xbf16, #tpu.memory_space<vmem>>, vector<16x8xbf16>
    tpu.vector_store %arg9[%c32, %c0_16], %21 {strides = array<i32>} : memref<256x8xbf16, #tpu.memory_space<vmem>>, vector<16x8xbf16>,
    %c0_17 = arith.constant 0 : index
    %c1 = arith.constant 1 : index
    %c0_18 = arith.constant 0 : index
    %c0_19 = arith.constant 0 : index
    %23 = vector.load %arg2[%c0_17, %c1, %c0_18, %c0_19] : memref<1x8x16x16xbf16, #tpu.memory_space<vmem>>, vector<1x1x16x16xbf16>
    %24 = vector.shape_cast %23 : vector<1x1x16x16xbf16> to vector<16x16xbf16>
    %cst_20 = arith.constant dense<0.000000e+00> : vector<16x8xf32>
    %25 = tpu.matmul %24, %2, %cst_20 {dimension_numbers = #tpu.dot_dimension_numbers<[1], [0], [0], [1], [0, 0, 1, 1], [], []>} : vector<16x16xbf16>, vector<16x8xbf16>, vector<16x8xf32> -> vector<16x8xf32>
    %26 = vector.broadcast %3 : vector<1x8xf32> to vector<16x8xf32>
    %27 = arith.addf %25, %26 : vector<16x8xf32>
    %cst_21 = arith.constant 0.000000e+00 : f32
    %28 = vector.broadcast %cst_21 : f32 to vector<16x8xf32>
    %29 = arith.cmpf oge, %27, %28 : vector<16x8xf32>
    %cst_22 = arith.constant 1.000000e-01 : f32
    %30 = vector.broadcast %cst_22 : f32 to vector<16x8xf32>
    %31 = arith.mulf %30, %27 : vector<16x8xf32>
    %32 = arith.select %29, %27, %31 : vector<16x8xi1>, vector<16x8xf32>
    %33 = arith.truncf %32 : vector<16x8xf32> to vector<16x8xbf16>
    %c56 = arith.constant 56 : index
    %c0_23 = arith.constant 0 : index
    %34 = vector.load %arg9[%c56, %c0_23] : memref<256x8xbf16, #tpu.memory_space<vmem>>, vector<16x8xbf16>
    tpu.vector_store %arg9[%c56, %c0_23], %33 {strides = array<i32>} : memref<256x8xbf16, #tpu.memory_space<vmem>>, vector<16x8xbf16>,
    %c0_24 = arith.constant 0 : index
    %c2 = arith.constant 2 : index
    %c0_25 = arith.constant 0 : index
    %c0_26 = arith.constant 0 : index
    %35 = vector.load %arg2[%c0_24, %c2, %c0_25, %c0_26] : memref<1x8x16x16xbf16, #tpu.memory_space<vmem>>, vector<1x1x16x16xbf16>
    %36 = vector.shape_cast %35 : vector<1x1x16x16xbf16> to vector<16x16xbf16>
    %cst_27 = arith.constant dense<0.000000e+00> : vector<16x8xf32>
    %37 = tpu.matmul %36, %2, %cst_27 {dimension_numbers = #tpu.dot_dimension_numbers<[1], [0], [0], [1], [0, 0, 1, 1], [], []>} : vector<16x16xbf16>, vector<16x8xbf16>, vector<16x8xf32> -> vector<16x8xf32>
    %38 = vector.broadcast %3 : vector<1x8xf32> to vector<16x8xf32>
    %39 = arith.addf %37, %38 : vector<16x8xf32>
    %cst_28 = arith.constant 0.000000e+00 : f32
    %40 = vector.broadcast %cst_28 : f32 to vector<16x8xf32>
    %41 = arith.cmpf oge, %39, %40 : vector<16x8xf32>
    %cst_29 = arith.constant 1.000000e-01 : f32
    %42 = vector.broadcast %cst_29 : f32 to vector<16x8xf32>
    %43 = arith.mulf %42, %39 : vector<16x8xf32>
    %44 = arith.select %41, %39, %43 : vector<16x8xi1>, vector<16x8xf32>
    %45 = arith.truncf %44 : vector<16x8xf32> to vector<16x8xbf16>
    %c80 = arith.constant 80 : index
    %c0_30 = arith.constant 0 : index
    %46 = vector.load %arg9[%c80, %c0_30] : memref<256x8xbf16, #tpu.memory_space<vmem>>, vector<16x8xbf16>
    tpu.vector_store %arg9[%c80, %c0_30], %45 {strides = array<i32>} : memref<256x8xbf16, #tpu.memory_space<vmem>>, vector<16x8xbf16>,
    %c0_31 = arith.constant 0 : index
    %c3 = arith.constant 3 : index
    %c0_32 = arith.constant 0 : index
    %c0_33 = arith.constant 0 : index
    %47 = vector.load %arg2[%c0_31, %c3, %c0_32, %c0_33] : memref<1x8x16x16xbf16, #tpu.memory_space<vmem>>, vector<1x1x16x16xbf16>
    %48 = vector.shape_cast %47 : vector<1x1x16x16xbf16> to vector<16x16xbf16>
    %cst_34 = arith.constant dense<0.000000e+00> : vector<16x8xf32>
    %49 = tpu.matmul %48, %2, %cst_34 {dimension_numbers = #tpu.dot_dimension_numbers<[1], [0], [0], [1], [0, 0, 1, 1], [], []>} : vector<16x16xbf16>, vector<16x8xbf16>, vector<16x8xf32> -> vector<16x8xf32>
    %50 = vector.broadcast %3 : vector<1x8xf32> to vector<16x8xf32>
    %51 = arith.addf %49, %50 : vector<16x8xf32>
    %cst_35 = arith.constant 0.000000e+00 : f32
    %52 = vector.broadcast %cst_35 : f32 to vector<16x8xf32>
    %53 = arith.cmpf oge, %51, %52 : vector<16x8xf32>
    %cst_36 = arith.constant 1.000000e-01 : f32
    %54 = vector.broadcast %cst_36 : f32 to vector<16x8xf32>
    %55 = arith.mulf %54, %51 : vector<16x8xf32>
    %56 = arith.select %53, %51, %55 : vector<16x8xi1>, vector<16x8xf32>
    %57 = arith.truncf %56 : vector<16x8xf32> to vector<16x8xbf16>
    %c104 = arith.constant 104 : index
    %c0_37 = arith.constant 0 : index
    %58 = vector.load %arg9[%c104, %c0_37] : memref<256x8xbf16, #tpu.memory_space<vmem>>, vector<16x8xbf16>
    tpu.vector_store %arg9[%c104, %c0_37], %57 {strides = array<i32>} : memref<256x8xbf16, #tpu.memory_space<vmem>>, vector<16x8xbf16>,
    %c0_38 = arith.constant 0 : index
    %c4 = arith.constant 4 : index
    %c0_39 = arith.constant 0 : index
    %c0_40 = arith.constant 0 : index
    %59 = vector.load %arg2[%c0_38, %c4, %c0_39, %c0_40] : memref<1x8x16x16xbf16, #tpu.memory_space<vmem>>, vector<1x1x16x16xbf16>
    %60 = vector.shape_cast %59 : vector<1x1x16x16xbf16> to vector<16x16xbf16>
    %cst_41 = arith.constant dense<0.000000e+00> : vector<16x8xf32>
    %61 = tpu.matmul %60, %2, %cst_41 {dimension_numbers = #tpu.dot_dimension_numbers<[1], [0], [0], [1], [0, 0, 1, 1], [], []>} : vector<16x16xbf16>, vector<16x8xbf16>, vector<16x8xf32> -> vector<16x8xf32>
    %62 = vector.broadcast %3 : vector<1x8xf32> to vector<16x8xf32>
    %63 = arith.addf %61, %62 : vector<16x8xf32>
    %cst_42 = arith.constant 0.000000e+00 : f32
    %64 = vector.broadcast %cst_42 : f32 to vector<16x8xf32>
    %65 = arith.cmpf oge, %63, %64 : vector<16x8xf32>
    %cst_43 = arith.constant 1.000000e-01 : f32
    %66 = vector.broadcast %cst_43 : f32 to vector<16x8xf32>
    %67 = arith.mulf %66, %63 : vector<16x8xf32>
    %68 = arith.select %65, %63, %67 : vector<16x8xi1>, vector<16x8xf32>
    %69 = arith.truncf %68 : vector<16x8xf32> to vector<16x8xbf16>
    %c128 = arith.constant 128 : index
    %c0_44 = arith.constant 0 : index
    %70 = vector.load %arg9[%c128, %c0_44] : memref<256x8xbf16, #tpu.memory_space<vmem>>, vector<16x8xbf16>
    tpu.vector_store %arg9[%c128, %c0_44], %69 {strides = array<i32>} : memref<256x8xbf16, #tpu.memory_space<vmem>>, vector<16x8xbf16>,
    %c0_45 = arith.constant 0 : index
    %c5 = arith.constant 5 : index
    %c0_46 = arith.constant 0 : index
    %c0_47 = arith.constant 0 : index
    %71 = vector.load %arg2[%c0_45, %c5, %c0_46, %c0_47] : memref<1x8x16x16xbf16, #tpu.memory_space<vmem>>, vector<1x1x16x16xbf16>
    %72 = vector.shape_cast %71 : vector<1x1x16x16xbf16> to vector<16x16xbf16>
    %cst_48 = arith.constant dense<0.000000e+00> : vector<16x8xf32>
    %73 = tpu.matmul %72, %2, %cst_48 {dimension_numbers = #tpu.dot_dimension_numbers<[1], [0], [0], [1], [0, 0, 1, 1], [], []>} : vector<16x16xbf16>, vector<16x8xbf16>, vector<16x8xf32> -> vector<16x8xf32>
    %74 = vector.broadcast %3 : vector<1x8xf32> to vector<16x8xf32>
    %75 = arith.addf %73, %74 : vector<16x8xf32>
    %cst_49 = arith.constant 0.000000e+00 : f32
    %76 = vector.broadcast %cst_49 : f32 to vector<16x8xf32>
    %77 = arith.cmpf oge, %75, %76 : vector<16x8xf32>
    %cst_50 = arith.constant 1.000000e-01 : f32
    %78 = vector.broadcast %cst_50 : f32 to vector<16x8xf32>
    %79 = arith.mulf %78, %75 : vector<16x8xf32>
    %80 = arith.select %77, %75, %79 : vector<16x8xi1>, vector<16x8xf32>
    %81 = arith.truncf %80 : vector<16x8xf32> to vector<16x8xbf16>
    %c152 = arith.constant 152 : index
    %c0_51 = arith.constant 0 : index
    %82 = vector.load %arg9[%c152, %c0_51] : memref<256x8xbf16, #tpu.memory_space<vmem>>, vector<16x8xbf16>
    tpu.vector_store %arg9[%c152, %c0_51], %81 {strides = array<i32>} : memref<256x8xbf16, #tpu.memory_space<vmem>>, vector<16x8xbf16>,
    %c0_52 = arith.constant 0 : index
    %c6 = arith.constant 6 : index
    %c0_53 = arith.constant 0 : index
    %c0_54 = arith.constant 0 : index
    %83 = vector.load %arg2[%c0_52, %c6, %c0_53, %c0_54] : memref<1x8x16x16xbf16, #tpu.memory_space<vmem>>, vector<1x1x16x16xbf16>
    %84 = vector.shape_cast %83 : vector<1x1x16x16xbf16> to vector<16x16xbf16>
    %cst_55 = arith.constant dense<0.000000e+00> : vector<16x8xf32>
    %85 = tpu.matmul %84, %2, %cst_55 {dimension_numbers = #tpu.dot_dimension_numbers<[1], [0], [0], [1], [0, 0, 1, 1], [], []>} : vector<16x16xbf16>, vector<16x8xbf16>, vector<16x8xf32> -> vector<16x8xf32>
    %86 = vector.broadcast %3 : vector<1x8xf32> to vector<16x8xf32>
    %87 = arith.addf %85, %86 : vector<16x8xf32>
    %cst_56 = arith.constant 0.000000e+00 : f32
    %88 = vector.broadcast %cst_56 : f32 to vector<16x8xf32>
    %89 = arith.cmpf oge, %87, %88 : vector<16x8xf32>
    %cst_57 = arith.constant 1.000000e-01 : f32
    %90 = vector.broadcast %cst_57 : f32 to vector<16x8xf32>
    %91 = arith.mulf %90, %87 : vector<16x8xf32>
    %92 = arith.select %89, %87, %91 : vector<16x8xi1>, vector<16x8xf32>
    %93 = arith.truncf %92 : vector<16x8xf32> to vector<16x8xbf16>
    %c176 = arith.constant 176 : index
    %c0_58 = arith.constant 0 : index
    %94 = vector.load %arg9[%c176, %c0_58] : memref<256x8xbf16, #tpu.memory_space<vmem>>, vector<16x8xbf16>
    tpu.vector_store %arg9[%c176, %c0_58], %93 {strides = array<i32>} : memref<256x8xbf16, #tpu.memory_space<vmem>>, vector<16x8xbf16>,
    %c0_59 = arith.constant 0 : index
    %c7 = arith.constant 7 : index
    %c0_60 = arith.constant 0 : index
    %c0_61 = arith.constant 0 : index
    %95 = vector.load %arg2[%c0_59, %c7, %c0_60, %c0_61] : memref<1x8x16x16xbf16, #tpu.memory_space<vmem>>, vector<1x1x16x16xbf16>
    %96 = vector.shape_cast %95 : vector<1x1x16x16xbf16> to vector<16x16xbf16>
    %cst_62 = arith.constant dense<0.000000e+00> : vector<16x8xf32>
    %97 = tpu.matmul %96, %2, %cst_62 {dimension_numbers = #tpu.dot_dimension_numbers<[1], [0], [0], [1], [0, 0, 1, 1], [], []>} : vector<16x16xbf16>, vector<16x8xbf16>, vector<16x8xf32> -> vector<16x8xf32>
    %98 = vector.broadcast %3 : vector<1x8xf32> to vector<16x8xf32>
    %99 = arith.addf %97, %98 : vector<16x8xf32>
    %cst_63 = arith.constant 0.000000e+00 : f32
    %100 = vector.broadcast %cst_63 : f32 to vector<16x8xf32>
    %101 = arith.cmpf oge, %99, %100 : vector<16x8xf32>
    %cst_64 = arith.constant 1.000000e-01 : f32
    %102 = vector.broadcast %cst_64 : f32 to vector<16x8xf32>
    %103 = arith.mulf %102, %99 : vector<16x8xf32>
    %104 = arith.select %101, %99, %103 : vector<16x8xi1>, vector<16x8xf32>
    %105 = arith.truncf %104 : vector<16x8xf32> to vector<16x8xbf16>
    %c200 = arith.constant 200 : index
    %c0_65 = arith.constant 0 : index
    %106 = vector.load %arg9[%c200, %c0_65] : memref<256x8xbf16, #tpu.memory_space<vmem>>, vector<16x8xbf16>
    tpu.vector_store %arg9[%c200, %c0_65], %105 {strides = array<i32>} : memref<256x8xbf16, #tpu.memory_space<vmem>>, vector<16x8xbf16>,
    %c7_66 = arith.constant 7 : index
    %c0_67 = arith.constant 0 : index
    %107 = vector.load %arg9[%c7_66, %c0_67] : memref<256x8xbf16, #tpu.memory_space<vmem>>, vector<192x8xbf16>
    %c0_68 = arith.constant 0 : index
    %c0_69 = arith.constant 0 : index
    %c0_70 = arith.constant 0 : index
    %108 = vector.load %arg6[%c0_68, %c0_69, %c0_70] : memref<9x8x16xbf16, #tpu.memory_space<vmem>>, vector<1x8x16xbf16>
    %109 = vector.shape_cast %108 : vector<1x8x16xbf16> to vector<8x16xbf16>
    %cst_71 = arith.constant dense<0.000000e+00> : vector<192x16xf32>
    %110 = tpu.matmul %107, %109, %cst_71 {dimension_numbers = #tpu.dot_dimension_numbers<[1], [0], [0], [1], [0, 0, 1, 1], [], []>} : vector<192x8xbf16>, vector<8x16xbf16>, vector<192x16xf32> -> vector<192x16xf32>
    %c8 = arith.constant 8 : index
    %c0_72 = arith.constant 0 : index
    %111 = vector.load %arg9[%c8, %c0_72] : memref<256x8xbf16, #tpu.memory_space<vmem>>, vector<192x8xbf16>
    %c1_73 = arith.constant 1 : index
    %c0_74 = arith.constant 0 : index
    %c0_75 = arith.constant 0 : index
    %112 = vector.load %arg6[%c1_73, %c0_74, %c0_75] : memref<9x8x16xbf16, #tpu.memory_space<vmem>>, vector<1x8x16xbf16>
    %113 = vector.shape_cast %112 : vector<1x8x16xbf16> to vector<8x16xbf16>
    %cst_76 = arith.constant dense<0.000000e+00> : vector<192x16xf32>
    %114 = tpu.matmul %111, %113, %cst_76 {dimension_numbers = #tpu.dot_dimension_numbers<[1], [0], [0], [1], [0, 0, 1, 1], [], []>} : vector<192x8xbf16>, vector<8x16xbf16>, vector<192x16xf32> -> vector<192x16xf32>
    %115 = arith.addf %110, %114 : vector<192x16xf32>
    %c9 = arith.constant 9 : index
    %c0_77 = arith.constant 0 : index
    %116 = vector.load %arg9[%c9, %c0_77] : memref<256x8xbf16, #tpu.memory_space<vmem>>, vector<192x8xbf16>
    %c2_78 = arith.constant 2 : index
    %c0_79 = arith.constant 0 : index
    %c0_80 = arith.constant 0 : index
    %117 = vector.load %arg6[%c2_78, %c0_79, %c0_80] : memref<9x8x16xbf16, #tpu.memory_space<vmem>>, vector<1x8x16xbf16>
    %118 = vector.shape_cast %117 : vector<1x8x16xbf16> to vector<8x16xbf16>
    %cst_81 = arith.constant dense<0.000000e+00> : vector<192x16xf32>
    %119 = tpu.matmul %116, %118, %cst_81 {dimension_numbers = #tpu.dot_dimension_numbers<[1], [0], [0], [1], [0, 0, 1, 1], [], []>} : vector<192x8xbf16>, vector<8x16xbf16>, vector<192x16xf32> -> vector<192x16xf32>
    %120 = arith.addf %115, %119 : vector<192x16xf32>
    %c31 = arith.constant 31 : index
    %c0_82 = arith.constant 0 : index
    %121 = vector.load %arg9[%c31, %c0_82] : memref<256x8xbf16, #tpu.memory_space<vmem>>, vector<192x8xbf16>
    %c3_83 = arith.constant 3 : index
    %c0_84 = arith.constant 0 : index
    %c0_85 = arith.constant 0 : index
    %122 = vector.load %arg6[%c3_83, %c0_84, %c0_85] : memref<9x8x16xbf16, #tpu.memory_space<vmem>>, vector<1x8x16xbf16>
    %123 = vector.shape_cast %122 : vector<1x8x16xbf16> to vector<8x16xbf16>
    %cst_86 = arith.constant dense<0.000000e+00> : vector<192x16xf32>
    %124 = tpu.matmul %121, %123, %cst_86 {dimension_numbers = #tpu.dot_dimension_numbers<[1], [0], [0], [1], [0, 0, 1, 1], [], []>} : vector<192x8xbf16>, vector<8x16xbf16>, vector<192x16xf32> -> vector<192x16xf32>
    %125 = arith.addf %120, %124 : vector<192x16xf32>
    %c32_87 = arith.constant 32 : index
    %c0_88 = arith.constant 0 : index
    %126 = vector.load %arg9[%c32_87, %c0_88] : memref<256x8xbf16, #tpu.memory_space<vmem>>, vector<192x8xbf16>
    %c4_89 = arith.constant 4 : index
    %c0_90 = arith.constant 0 : index
    %c0_91 = arith.constant 0 : index
    %127 = vector.load %arg6[%c4_89, %c0_90, %c0_91] : memref<9x8x16xbf16, #tpu.memory_space<vmem>>, vector<1x8x16xbf16>
    %128 = vector.shape_cast %127 : vector<1x8x16xbf16> to vector<8x16xbf16>
    %cst_92 = arith.constant dense<0.000000e+00> : vector<192x16xf32>
    %129 = tpu.matmul %126, %128, %cst_92 {dimension_numbers = #tpu.dot_dimension_numbers<[1], [0], [0], [1], [0, 0, 1, 1], [], []>} : vector<192x8xbf16>, vector<8x16xbf16>, vector<192x16xf32> -> vector<192x16xf32>
    %130 = arith.addf %125, %129 : vector<192x16xf32>
    %c33 = arith.constant 33 : index
    %c0_93 = arith.constant 0 : index
    %131 = vector.load %arg9[%c33, %c0_93] : memref<256x8xbf16, #tpu.memory_space<vmem>>, vector<192x8xbf16>
    %c5_94 = arith.constant 5 : index
    %c0_95 = arith.constant 0 : index
    %c0_96 = arith.constant 0 : index
    %132 = vector.load %arg6[%c5_94, %c0_95, %c0_96] : memref<9x8x16xbf16, #tpu.memory_space<vmem>>, vector<1x8x16xbf16>
    %133 = vector.shape_cast %132 : vector<1x8x16xbf16> to vector<8x16xbf16>
    %cst_97 = arith.constant dense<0.000000e+00> : vector<192x16xf32>
    %134 = tpu.matmul %131, %133, %cst_97 {dimension_numbers = #tpu.dot_dimension_numbers<[1], [0], [0], [1], [0, 0, 1, 1], [], []>} : vector<192x8xbf16>, vector<8x16xbf16>, vector<192x16xf32> -> vector<192x16xf32>
    %135 = arith.addf %130, %134 : vector<192x16xf32>
    %c55 = arith.constant 55 : index
    %c0_98 = arith.constant 0 : index
    %136 = vector.load %arg9[%c55, %c0_98] : memref<256x8xbf16, #tpu.memory_space<vmem>>, vector<192x8xbf16>
    %c6_99 = arith.constant 6 : index
    %c0_100 = arith.constant 0 : index
    %c0_101 = arith.constant 0 : index
    %137 = vector.load %arg6[%c6_99, %c0_100, %c0_101] : memref<9x8x16xbf16, #tpu.memory_space<vmem>>, vector<1x8x16xbf16>
    %138 = vector.shape_cast %137 : vector<1x8x16xbf16> to vector<8x16xbf16>
    %cst_102 = arith.constant dense<0.000000e+00> : vector<192x16xf32>
    %139 = tpu.matmul %136, %138, %cst_102 {dimension_numbers = #tpu.dot_dimension_numbers<[1], [0], [0], [1], [0, 0, 1, 1], [], []>} : vector<192x8xbf16>, vector<8x16xbf16>, vector<192x16xf32> -> vector<192x16xf32>
    %140 = arith.addf %135, %139 : vector<192x16xf32>
    %c56_103 = arith.constant 56 : index
    %c0_104 = arith.constant 0 : index
    %141 = vector.load %arg9[%c56_103, %c0_104] : memref<256x8xbf16, #tpu.memory_space<vmem>>, vector<192x8xbf16>
    %c7_105 = arith.constant 7 : index
    %c0_106 = arith.constant 0 : index
    %c0_107 = arith.constant 0 : index
    %142 = vector.load %arg6[%c7_105, %c0_106, %c0_107] : memref<9x8x16xbf16, #tpu.memory_space<vmem>>, vector<1x8x16xbf16>
    %143 = vector.shape_cast %142 : vector<1x8x16xbf16> to vector<8x16xbf16>
    %cst_108 = arith.constant dense<0.000000e+00> : vector<192x16xf32>
    %144 = tpu.matmul %141, %143, %cst_108 {dimension_numbers = #tpu.dot_dimension_numbers<[1], [0], [0], [1], [0, 0, 1, 1], [], []>} : vector<192x8xbf16>, vector<8x16xbf16>, vector<192x16xf32> -> vector<192x16xf32>
    %145 = arith.addf %140, %144 : vector<192x16xf32>
    %c57 = arith.constant 57 : index
    %c0_109 = arith.constant 0 : index
    %146 = vector.load %arg9[%c57, %c0_109] : memref<256x8xbf16, #tpu.memory_space<vmem>>, vector<192x8xbf16>
    %c8_110 = arith.constant 8 : index
    %c0_111 = arith.constant 0 : index
    %c0_112 = arith.constant 0 : index
    %147 = vector.load %arg6[%c8_110, %c0_111, %c0_112] : memref<9x8x16xbf16, #tpu.memory_space<vmem>>, vector<1x8x16xbf16>
    %148 = vector.shape_cast %147 : vector<1x8x16xbf16> to vector<8x16xbf16>
    %cst_113 = arith.constant dense<0.000000e+00> : vector<192x16xf32>
    %149 = tpu.matmul %146, %148, %cst_113 {dimension_numbers = #tpu.dot_dimension_numbers<[1], [0], [0], [1], [0, 0, 1, 1], [], []>} : vector<192x8xbf16>, vector<8x16xbf16>, vector<192x16xf32> -> vector<192x16xf32>
    %150 = arith.addf %145, %149 : vector<192x16xf32>
    %151 = vector.broadcast %4 : vector<1x16xf32> to vector<192x16xf32>
    %152 = arith.addf %150, %151 : vector<192x16xf32>
    %cst_114 = arith.constant 0.000000e+00 : f32
    %153 = vector.broadcast %cst_114 : f32 to vector<192x16xf32>
    %154 = arith.cmpf oge, %152, %153 : vector<192x16xf32>
    %cst_115 = arith.constant 1.000000e-01 : f32
    %155 = vector.broadcast %cst_115 : f32 to vector<192x16xf32>
    %156 = arith.mulf %155, %152 : vector<192x16xf32>
    %157 = arith.select %154, %152, %156 : vector<192x16xi1>, vector<192x16xf32>
    %c0_116 = arith.constant 0 : index
    %c0_117 = arith.constant 0 : index
    %c0_118 = arith.constant 0 : index
    %c0_119 = arith.constant 0 : index
    %158 = vector.load %arg2[%c0_116, %c0_117, %c0_118, %c0_119] : memref<1x8x16x16xbf16, #tpu.memory_space<vmem>>, vector<1x1x16x16xbf16>
    %159 = vector.shape_cast %158 : vector<1x1x16x16xbf16> to vector<16x16xbf16>
    %160 = arith.extf %159 : vector<16x16xbf16> to vector<16x16xf32>
    %161 = vector.extract_strided_slice %157 {offsets = [0, 0], sizes = [16, 16], strides = [1, 1]} : vector<192x16xf32> to vector<16x16xf32>
    %162 = arith.addf %161, %160 : vector<16x16xf32>
    %c0_120 = arith.constant 0 : index
    %c0_121 = arith.constant 0 : index
    %c0_122 = arith.constant 0 : index
    %c0_123 = arith.constant 0 : index
    %163 = vector.load %arg8[%c0_120, %c0_121, %c0_122, %c0_123] : memref<1x8x16x16xf32, #tpu.memory_space<vmem>>, vector<1x1x16x16xf32>
    %164 = vector.shape_cast %163 : vector<1x1x16x16xf32> to vector<16x16xf32>
    %165 = vector.shape_cast %162 : vector<16x16xf32> to vector<1x1x16x16xf32>
    tpu.vector_store %arg8[%c0_120, %c0_121, %c0_122, %c0_123], %165 {strides = array<i32>} : memref<1x8x16x16xf32, #tpu.memory_space<vmem>>, vector<1x1x16x16xf32>,
    %c0_124 = arith.constant 0 : index
    %c1_125 = arith.constant 1 : index
    %c0_126 = arith.constant 0 : index
    %c0_127 = arith.constant 0 : index
    %166 = vector.load %arg2[%c0_124, %c1_125, %c0_126, %c0_127] : memref<1x8x16x16xbf16, #tpu.memory_space<vmem>>, vector<1x1x16x16xbf16>
    %167 = vector.shape_cast %166 : vector<1x1x16x16xbf16> to vector<16x16xbf16>
    %168 = arith.extf %167 : vector<16x16xbf16> to vector<16x16xf32>
    %169 = vector.extract_strided_slice %157 {offsets = [24, 0], sizes = [16, 16], strides = [1, 1]} : vector<192x16xf32> to vector<16x16xf32>
    %170 = arith.addf %169, %168 : vector<16x16xf32>
    %c0_128 = arith.constant 0 : index
    %c1_129 = arith.constant 1 : index
    %c0_130 = arith.constant 0 : index
    %c0_131 = arith.constant 0 : index
    %171 = vector.load %arg8[%c0_128, %c1_129, %c0_130, %c0_131] : memref<1x8x16x16xf32, #tpu.memory_space<vmem>>, vector<1x1x16x16xf32>
    %172 = vector.shape_cast %171 : vector<1x1x16x16xf32> to vector<16x16xf32>
    %173 = vector.shape_cast %170 : vector<16x16xf32> to vector<1x1x16x16xf32>
    tpu.vector_store %arg8[%c0_128, %c1_129, %c0_130, %c0_131], %173 {strides = array<i32>} : memref<1x8x16x16xf32, #tpu.memory_space<vmem>>, vector<1x1x16x16xf32>,
    %c0_132 = arith.constant 0 : index
    %c2_133 = arith.constant 2 : index
    %c0_134 = arith.constant 0 : index
    %c0_135 = arith.constant 0 : index
    %174 = vector.load %arg2[%c0_132, %c2_133, %c0_134, %c0_135] : memref<1x8x16x16xbf16, #tpu.memory_space<vmem>>, vector<1x1x16x16xbf16>
    %175 = vector.shape_cast %174 : vector<1x1x16x16xbf16> to vector<16x16xbf16>
    %176 = arith.extf %175 : vector<16x16xbf16> to vector<16x16xf32>
    %177 = vector.extract_strided_slice %157 {offsets = [48, 0], sizes = [16, 16], strides = [1, 1]} : vector<192x16xf32> to vector<16x16xf32>
    %178 = arith.addf %177, %176 : vector<16x16xf32>
    %c0_136 = arith.constant 0 : index
    %c2_137 = arith.constant 2 : index
    %c0_138 = arith.constant 0 : index
    %c0_139 = arith.constant 0 : index
    %179 = vector.load %arg8[%c0_136, %c2_137, %c0_138, %c0_139] : memref<1x8x16x16xf32, #tpu.memory_space<vmem>>, vector<1x1x16x16xf32>
    %180 = vector.shape_cast %179 : vector<1x1x16x16xf32> to vector<16x16xf32>
    %181 = vector.shape_cast %178 : vector<16x16xf32> to vector<1x1x16x16xf32>
    tpu.vector_store %arg8[%c0_136, %c2_137, %c0_138, %c0_139], %181 {strides = array<i32>} : memref<1x8x16x16xf32, #tpu.memory_space<vmem>>, vector<1x1x16x16xf32>,
    %c0_140 = arith.constant 0 : index
    %c3_141 = arith.constant 3 : index
    %c0_142 = arith.constant 0 : index
    %c0_143 = arith.constant 0 : index
    %182 = vector.load %arg2[%c0_140, %c3_141, %c0_142, %c0_143] : memref<1x8x16x16xbf16, #tpu.memory_space<vmem>>, vector<1x1x16x16xbf16>
    %183 = vector.shape_cast %182 : vector<1x1x16x16xbf16> to vector<16x16xbf16>
    %184 = arith.extf %183 : vector<16x16xbf16> to vector<16x16xf32>
    %185 = vector.extract_strided_slice %157 {offsets = [72, 0], sizes = [16, 16], strides = [1, 1]} : vector<192x16xf32> to vector<16x16xf32>
    %186 = arith.addf %185, %184 : vector<16x16xf32>
    %c0_144 = arith.constant 0 : index
    %c3_145 = arith.constant 3 : index
    %c0_146 = arith.constant 0 : index
    %c0_147 = arith.constant 0 : index
    %187 = vector.load %arg8[%c0_144, %c3_145, %c0_146, %c0_147] : memref<1x8x16x16xf32, #tpu.memory_space<vmem>>, vector<1x1x16x16xf32>
    %188 = vector.shape_cast %187 : vector<1x1x16x16xf32> to vector<16x16xf32>
    %189 = vector.shape_cast %186 : vector<16x16xf32> to vector<1x1x16x16xf32>
    tpu.vector_store %arg8[%c0_144, %c3_145, %c0_146, %c0_147], %189 {strides = array<i32>} : memref<1x8x16x16xf32, #tpu.memory_space<vmem>>, vector<1x1x16x16xf32>,
    %c0_148 = arith.constant 0 : index
    %c4_149 = arith.constant 4 : index
    %c0_150 = arith.constant 0 : index
    %c0_151 = arith.constant 0 : index
    %190 = vector.load %arg2[%c0_148, %c4_149, %c0_150, %c0_151] : memref<1x8x16x16xbf16, #tpu.memory_space<vmem>>, vector<1x1x16x16xbf16>
    %191 = vector.shape_cast %190 : vector<1x1x16x16xbf16> to vector<16x16xbf16>
    %192 = arith.extf %191 : vector<16x16xbf16> to vector<16x16xf32>
    %193 = vector.extract_strided_slice %157 {offsets = [96, 0], sizes = [16, 16], strides = [1, 1]} : vector<192x16xf32> to vector<16x16xf32>
    %194 = arith.addf %193, %192 : vector<16x16xf32>
    %c0_152 = arith.constant 0 : index
    %c4_153 = arith.constant 4 : index
    %c0_154 = arith.constant 0 : index
    %c0_155 = arith.constant 0 : index
    %195 = vector.load %arg8[%c0_152, %c4_153, %c0_154, %c0_155] : memref<1x8x16x16xf32, #tpu.memory_space<vmem>>, vector<1x1x16x16xf32>
    %196 = vector.shape_cast %195 : vector<1x1x16x16xf32> to vector<16x16xf32>
    %197 = vector.shape_cast %194 : vector<16x16xf32> to vector<1x1x16x16xf32>
    tpu.vector_store %arg8[%c0_152, %c4_153, %c0_154, %c0_155], %197 {strides = array<i32>} : memref<1x8x16x16xf32, #tpu.memory_space<vmem>>, vector<1x1x16x16xf32>,
    %c0_156 = arith.constant 0 : index
    %c5_157 = arith.constant 5 : index
    %c0_158 = arith.constant 0 : index
    %c0_159 = arith.constant 0 : index
    %198 = vector.load %arg2[%c0_156, %c5_157, %c0_158, %c0_159] : memref<1x8x16x16xbf16, #tpu.memory_space<vmem>>, vector<1x1x16x16xbf16>
    %199 = vector.shape_cast %198 : vector<1x1x16x16xbf16> to vector<16x16xbf16>
    %200 = arith.extf %199 : vector<16x16xbf16> to vector<16x16xf32>
    %201 = vector.extract_strided_slice %157 {offsets = [120, 0], sizes = [16, 16], strides = [1, 1]} : vector<192x16xf32> to vector<16x16xf32>
    %202 = arith.addf %201, %200 : vector<16x16xf32>
    %c0_160 = arith.constant 0 : index
    %c5_161 = arith.constant 5 : index
    %c0_162 = arith.constant 0 : index
    %c0_163 = arith.constant 0 : index
    %203 = vector.load %arg8[%c0_160, %c5_161, %c0_162, %c0_163] : memref<1x8x16x16xf32, #tpu.memory_space<vmem>>, vector<1x1x16x16xf32>
    %204 = vector.shape_cast %203 : vector<1x1x16x16xf32> to vector<16x16xf32>
    %205 = vector.shape_cast %202 : vector<16x16xf32> to vector<1x1x16x16xf32>
    tpu.vector_store %arg8[%c0_160, %c5_161, %c0_162, %c0_163], %205 {strides = array<i32>} : memref<1x8x16x16xf32, #tpu.memory_space<vmem>>, vector<1x1x16x16xf32>,
    %c0_164 = arith.constant 0 : index
    %c6_165 = arith.constant 6 : index
    %c0_166 = arith.constant 0 : index
    %c0_167 = arith.constant 0 : index
    %206 = vector.load %arg2[%c0_164, %c6_165, %c0_166, %c0_167] : memref<1x8x16x16xbf16, #tpu.memory_space<vmem>>, vector<1x1x16x16xbf16>
    %207 = vector.shape_cast %206 : vector<1x1x16x16xbf16> to vector<16x16xbf16>
    %208 = arith.extf %207 : vector<16x16xbf16> to vector<16x16xf32>
    %209 = vector.extract_strided_slice %157 {offsets = [144, 0], sizes = [16, 16], strides = [1, 1]} : vector<192x16xf32> to vector<16x16xf32>
    %210 = arith.addf %209, %208 : vector<16x16xf32>
    %c0_168 = arith.constant 0 : index
    %c6_169 = arith.constant 6 : index
    %c0_170 = arith.constant 0 : index
    %c0_171 = arith.constant 0 : index
    %211 = vector.load %arg8[%c0_168, %c6_169, %c0_170, %c0_171] : memref<1x8x16x16xf32, #tpu.memory_space<vmem>>, vector<1x1x16x16xf32>
    %212 = vector.shape_cast %211 : vector<1x1x16x16xf32> to vector<16x16xf32>
    %213 = vector.shape_cast %210 : vector<16x16xf32> to vector<1x1x16x16xf32>
    tpu.vector_store %arg8[%c0_168, %c6_169, %c0_170, %c0_171], %213 {strides = array<i32>} : memref<1x8x16x16xf32, #tpu.memory_space<vmem>>, vector<1x1x16x16xf32>,
    %c0_172 = arith.constant 0 : index
    %c7_173 = arith.constant 7 : index
    %c0_174 = arith.constant 0 : index
    %c0_175 = arith.constant 0 : index
    %214 = vector.load %arg2[%c0_172, %c7_173, %c0_174, %c0_175] : memref<1x8x16x16xbf16, #tpu.memory_space<vmem>>, vector<1x1x16x16xbf16>
    %215 = vector.shape_cast %214 : vector<1x1x16x16xbf16> to vector<16x16xbf16>
    %216 = arith.extf %215 : vector<16x16xbf16> to vector<16x16xf32>
    %217 = vector.extract_strided_slice %157 {offsets = [168, 0], sizes = [16, 16], strides = [1, 1]} : vector<192x16xf32> to vector<16x16xf32>
    %218 = arith.addf %217, %216 : vector<16x16xf32>
    %c0_176 = arith.constant 0 : index
    %c7_177 = arith.constant 7 : index
    %c0_178 = arith.constant 0 : index
    %c0_179 = arith.constant 0 : index
    %219 = vector.load %arg8[%c0_176, %c7_177, %c0_178, %c0_179] : memref<1x8x16x16xf32, #tpu.memory_space<vmem>>, vector<1x1x16x16xf32>
    %220 = vector.shape_cast %219 : vector<1x1x16x16xf32> to vector<16x16xf32>
    %221 = vector.shape_cast %218 : vector<16x16xf32> to vector<1x1x16x16xf32>
    tpu.vector_store %arg8[%c0_176, %c7_177, %c0_178, %c0_179], %221 {strides = array<i32>} : memref<1x8x16x16xf32, #tpu.memory_space<vmem>>, vector<1x1x16x16xf32>,
    return
  }
  func.func @transform_0(%arg0: i32, %arg1: i32) -> (i32, i32, i32, i32) {
    %c0_i32 = arith.constant 0 : i32
    %c0_i32_0 = arith.constant 0 : i32
    %c0_i32_1 = arith.constant 0 : i32
    return %arg0, %arg1, %c0_i32, %c0_i32_0 : i32, i32, i32, i32
  }
  func.func @transform_1(%arg0: i32, %arg1: i32) -> (i32, i32, i32, i32) {
    %c0_i32 = arith.constant 0 : i32
    %c0_i32_0 = arith.constant 0 : i32
    %c0_i32_1 = arith.constant 0 : i32
    return %arg0, %arg1, %c0_i32, %c0_i32_0 : i32, i32, i32, i32
  }
  func.func @transform_2(%arg0: i32, %arg1: i32) -> (i32, i32) {
    %c0_i32 = arith.constant 0 : i32
    %c0_i32_0 = arith.constant 0 : i32
    %c0_i32_1 = arith.constant 0 : i32
    return %c0_i32, %c0_i32_0 : i32, i32
  }
  func.func @transform_3(%arg0: i32, %arg1: i32) -> (i32, i32) {
    %c0_i32 = arith.constant 0 : i32
    %c0_i32_0 = arith.constant 0 : i32
    %c0_i32_1 = arith.constant 0 : i32
    return %c0_i32, %c0_i32_0 : i32, i32
  }
  func.func @transform_4(%arg0: i32, %arg1: i32) -> (i32, i32, i32) {
    %c0_i32 = arith.constant 0 : i32
    %c0_i32_0 = arith.constant 0 : i32
    %c0_i32_1 = arith.constant 0 : i32
    %c0_i32_2 = arith.constant 0 : i32
    return %c0_i32, %c0_i32_0, %c0_i32_1 : i32, i32, i32
  }
  func.func @transform_5(%arg0: i32, %arg1: i32) -> (i32, i32) {
    %c0_i32 = arith.constant 0 : i32
    %c0_i32_0 = arith.constant 0 : i32
    %c0_i32_1 = arith.constant 0 : i32
    return %c0_i32, %c0_i32_0 : i32, i32
  }
  func.func @transform_6(%arg0: i32, %arg1: i32) -> (i32, i32, i32, i32) {
    %c0_i32 = arith.constant 0 : i32
    %c0_i32_0 = arith.constant 0 : i32
    %c0_i32_1 = arith.constant 0 : i32
    return %arg0, %arg1, %c0_i32, %c0_i32_0 : i32, i32, i32, i32
  }
}

</mosaic_0001>

<bundles_post_ra>
// kernel: _lambda_.1
= control target key start
LH: loop header
LB: loop body
LE: loop exit
PB: predicated region body
PF: predicated region fallthrough
CT: control target
= control target key end

     0   :  { %s4249_s21 = smov 0   ;;  %s4251_s22 = smov 0   ;;  %s5041_s0 = inlined_call_operand.vmem [shape: bf16[2,16,16,16], index: 0, kind: input, shape index: {}]   ;;  %s5042_s1 = inlined_call_operand.vmem [shape: bf16[2,4,16,16], index: 1, kind: input, shape index: {}]   ;;  %s5043_s2 = inlined_call_operand.vmem [shape: bf16[16,8], index: 2, kind: input, shape index: {}]   ;;  %s5044_s3 = inlined_call_operand.vmem [shape: f32[1,8], index: 3, kind: input, shape index: {}]   ;;  %s5045_s4 = inlined_call_operand.vmem [shape: bf16[9,8,16], index: 4, kind: input, shape index: {}]   ;;  %s5046_s5 = inlined_call_operand.vmem [shape: f32[1,16], index: 5, kind: input, shape index: {}]   ;;  %s5047_s6 = inlined_call_operand.vmem [shape: f32[2,16,16,16], index: 6, kind: output, shape index: {}]  }
   0x1   :  { %s4253_s23 = smov 0   ;;  %s4255_s24 = smov 0  }
   0x2   :  { %s4257_s25 = smov 0  }
   0x3 LB: > { %s25_s26 = sadd.s32 1, %s4203_s23  ;;  %s28_s27 = sadd.s32 1, %s4207_s24  ;;  %s4211_s25 = sphi %s4257_s25, %s16_s25   ;;  %s4207_s24 = sphi %s4255_s24, %s5054_s24   ;;  %s4203_s23 = sphi %s4253_s23, %s5053_s23   ;;  %s4199_s22 = sphi %s4251_s22, %s5052_s22   ;;  %s4195_s21 = sphi %s4249_s21, %s5051_s21  }
   0x4   : > { %p26_p0 = scmp.ge.s32.totalorder %s25_s26, 2  ;;  %p3266_p1 = scmp.ge.s32.totalorder %s4211_s25, 1 }
   0x5   : > { %p252_p2 = scmp.lt.s32.totalorder %s4211_s25, 5 }
   0x6   : > { %s5056_s26 = smov (%p26_p0, %s25_s26), 0  ;;  %s5058_s27 = smov (!%p26_p0, %s28_s27), %s4207_s24 }
   0x7   : > { %p253_p3 = pnand %p3266_p1, %p252_p2  ;;  %p30_p4 = scmp.ge.s32.totalorder %s5058_s27, 2 }
   0x9   : > { %s5060_s27 = smov (%p30_p4, %s5058_s27), 0  ;;  %256 = sbr.rel (%p253_p3) target bundleno = 1080 (0x438), region = 44 }
   0xe   : > { %s3267_s28 = sshll.u32 %s4195_s21, 3  ;;  %p303_p5 = scmp.lt.s32.totalorder %s4199_s22, 1  ;;  %vm336_vm0 = vcmask 60416   ;;  %v4285_v0 = vld [vmem:[%s5043_s2] sm:$0xf]  ;;  %v4213_v1 = vmov 0  }
   0xf   : > { %p305_p6 = scmp.lt.s32.totalorder %s3267_s28, 15  ;;  %s3271_s7 = sshll.u32 %s4195_s21, 1  ;;  %337 = vst.msk [vmem:[#allocation2] sm:$0xf] %vm336_vm0, %v4213_v1  ;;  %v4292_v2 = vld [vmem:[%s5043_s2] sm:$0xf] }
  0x10   : > { %s5062_s22 = smov (!%p303_p5, %s4199_s22), 1  ;;  %338 = vst.msk [vmem:[#allocation2 + $0x4] sm:$0xf] %vm336_vm0, %v4213_v1  ;;  %v3286_v3 = vld [vmem:[%s5043_s2] sm:$0xf]  ;;  %p4307_p7 = scmp.lt.s32.totalorder %s3271_s7, 3 }
  0x11   : > { %s5064_s28 = smov (!%p305_p6, %s3267_s28), 15  ;;  %339 = vst.msk [vmem:[#allocation2 + $0x8] sm:$0xf] %vm336_vm0, %v4213_v1  ;;  %v4304_v4 = vld [vmem:[%s5043_s2] sm:$0xf0]  ;;  %s3269_s14 = sshll.u32 %s5062_s22, 5 }
  0x12   : > { %340 = vst.msk [vmem:[#allocation2 + $0xc] sm:$0xf] %vm336_vm0, %v4213_v1  ;;  %v4315_v5 = vld [vmem:[%s5043_s2] sm:$0xf0]  ;;  %s3268_s18 = sshll.u32 %s5064_s28, 1  ;;  %s3273_s19 = sshll.u32 %s5062_s22, 3 }
  0x13   : > { %341 = vst.msk [vmem:[#allocation2 + $0x10] sm:$0xf] %vm336_vm0, %v4213_v1  ;;  %v3651_v6 = vld [vmem:[%s5043_s2] sm:$0xf0]  ;;  %s309_s30 = sadd.s32 %s3269_s14, %s3268_s18  ;;  %v4326_v7 = vld [vmem:[%s5044_s3] sm:$0x1] }
  0x14   : > { %342 = vst.msk [vmem:[#allocation2 + $0x14] sm:$0xf] %vm336_vm0, %v4213_v1  ;;  %v4331_v8 = vld [vmem:[%s5046_s5] sm:$0x1]  ;;  %s3270_s22 = sshll.u32 %s309_s30, 2  ;;  %s3278_s28 = sshll.u32 %s309_s30, 3 }
  0x15   : > { %343 = vst.msk [vmem:[#allocation2 + $0x18] sm:$0xf] %vm336_vm0, %v4213_v1  ;;  %s4337_s14 = scalar_lea.vmem %s5041_s0, %s3270_s22  ;;  %s4342_s18 = scalar_lea.vmem %s5047_s6, %s3278_s28 }
  0x16   : > { %344 = vst.msk [vmem:[#allocation2 + $0x1c] sm:$0xf] %vm336_vm0, %v4213_v1  ;;  %s5066_s7 = smov (!%p4307_p7, %s3271_s7), 3  ;;  %p3279_p8 = scmp.le.s32.totalorder %s4195_s21, 0 }
  0x17   : > { %345 = vst.msk [vmem:[#allocation2 + $0x20] sm:$0xf] %vm336_vm0, %v4213_v1  ;;  %s3272_s20 = sshll.u32 %s5066_s7, 1 }
  0x18   : > { %346 = vst.msk [vmem:[#allocation2 + $0x24] sm:$0xf] %vm336_vm0, %v4213_v1  ;;  %s320_s29 = sadd.s32 %s3273_s19, %s3272_s20 }
  0x19   : > { %347 = vst.msk [vmem:[#allocation2 + $0x28] sm:$0xf] %vm336_vm0, %v4213_v1  ;;  %s3274_s30 = sshll.u32 %s320_s29, 2 }
  0x1a   : > { %348 = vst.msk [vmem:[#allocation2 + $0x2c] sm:$0xf] %vm336_vm0, %v4213_v1  ;;  %s4355_s10 = scalar_lea.vmem %s5042_s1, %s3274_s30 }
  0x1b   : > { %349 = vst.msk [vmem:[#allocation2 + $0x30] sm:$0xf] %vm336_vm0, %v4213_v1 }
  0x1c   : > { %350 = vst.msk [vmem:[#allocation2 + $0x34] sm:$0xf] %vm336_vm0, %v4213_v1 }
  0x1d   : > { %351 = vst.msk [vmem:[#allocation2 + $0x38] sm:$0xf] %vm336_vm0, %v4213_v1 }
  0x1e   : > { %352 = vst.msk [vmem:[#allocation2 + $0x3c] sm:$0xf] %vm336_vm0, %v4213_v1 }
  0x1f   : > { %353 = vst.msk [vmem:[#allocation2 + $0x40] sm:$0xf] %vm336_vm0, %v4213_v1 }
  0x20   : > { %354 = vst.msk [vmem:[#allocation2 + $0x44] sm:$0xf] %vm336_vm0, %v4213_v1 }
  0x21   : > { %355 = vst.msk [vmem:[#allocation2 + $0x48] sm:$0xf] %vm336_vm0, %v4213_v1 }
  0x22   : > { %356 = vst.msk [vmem:[#allocation2 + $0x4c] sm:$0xf] %vm336_vm0, %v4213_v1 }
  0x23   : > { %357 = vst.msk [vmem:[#allocation2 + $0x50] sm:$0xf] %vm336_vm0, %v4213_v1 }
  0x24   : > { %358 = vst.msk [vmem:[#allocation2 + $0x54] sm:$0xf] %vm336_vm0, %v4213_v1 }
  0x25   : > { %359 = vst.msk [vmem:[#allocation2 + $0x58] sm:$0xf] %vm336_vm0, %v4213_v1 }
  0x26   : > { %360 = vst.msk [vmem:[#allocation2 + $0x5c] sm:$0xf] %vm336_vm0, %v4213_v1 }
  0x27   : > { %361 = vst.msk [vmem:[#allocation2 + $0x60] sm:$0xf] %vm336_vm0, %v4213_v1 }
  0x28   : > { %362 = vst.msk [vmem:[#allocation2 + $0x64] sm:$0xf] %vm336_vm0, %v4213_v1 }
  0x29   : > { %363 = vst.msk [vmem:[#allocation2 + $0x68] sm:$0xf] %vm336_vm0, %v4213_v1 }
  0x2a   : > { %364 = vst.msk [vmem:[#allocation2 + $0x6c] sm:$0xf] %vm336_vm0, %v4213_v1  ;;  %376 = sbr.rel (%p3279_p8) target bundleno = 194 (0xc2), region = 48 }
  0x2b   : > { %365 = vst.msk [vmem:[#allocation2 + $0x70] sm:$0xf] %vm336_vm0, %v4213_v1 }
  0x2c   : > { %366 = vst.msk [vmem:[#allocation2 + $0x74] sm:$0xf] %vm336_vm0, %v4213_v1 }
  0x2d   : > { %367 = vst.msk [vmem:[#allocation2 + $0x78] sm:$0xf] %vm336_vm0, %v4213_v1 }
  0x2e   : > { %368 = vst.msk [vmem:[#allocation2 + $0x7c] sm:$0xf] %vm336_vm0, %v4213_v1 }
  0x2f   : > { %v3287_v9 = vor.u32 %v3651_v6, %v3286_v3  ;;  %v3652_v10 = vld [vmem:[%s4355_s10] sm:$0xff]  ;;  %vm393_vm1 = vcmask 130048   ;;  %v380_v11 = vperm.slane %v4326_v7, 0 }
  0x31   : > { %404 = vmatpush.bf16.msra.mxu0 %v3287_v9 }
  0x34   : > { %3288 = vmatmul.msk.bf16.vlgmr.msra.gmra.mxu0 %vm393_vm1, %v3652_v10 }
  0xb1   : > { %v406_v12 = vpop.f32.mrf.mxu0 }
  0xb2   : > { %v407_v13 = vadd.f32 %v406_v12, %v380_v11 }
  0xb4   : > { %vm411_vm2 = vcmp.ge.f32.partialorder %v407_v13, 0.0  ;;  %v413_v14 = vmul.f32 0.1, %v407_v13 }
  0xb6   : > { %v415_v15 = vsel %vm411_vm2, %v407_v13, %v413_v14 }
  0xb7   : > { %v417_v16 = vpack.c.bf16 %v415_v15, %v415_v15 }
  0xb9   : > { %419 = vst.msk [vmem:[#allocation2 + $0x4] sm:$0xf] %vm336_vm0, %v417_v16  ;;  %v408_v17 = vpop.f32.mrf.mxu0 }
  0xba   : > { %v409_v18 = vadd.f32 %v408_v17, %v380_v11 }
  0xbc   : > { %vm412_vm3 = vcmp.ge.f32.partialorder %v409_v18, 0.0  ;;  %v414_v19 = vmul.f32 0.1, %v409_v18 }
  0xbe   : > { %v416_v20 = vsel %vm412_vm3, %v409_v18, %v414_v19 }
  0xbf   : > { %v418_v21 = vpack.c.bf16 %v416_v20, %v416_v20 }
  0xc1   : > { %420 = vst.msk [vmem:[#allocation2 + $0x8] sm:$0xf] %vm336_vm0, %v418_v21 }
  0xc2 PF: > { %p3289_p9 = scmp.ge.s32.totalorder %s4195_s21, 1 }
  0xc4   : > { %424 = sbr.rel (%p3289_p9) target bundleno = 348 (0x15c), region = 52 }
  0xc9   : > { %v3299_v22 = vor.u32 %v4315_v5, %v4292_v2  ;;  %v3653_v23 = vld [vmem:[%s4355_s10 + $0x8] sm:$0xff]  ;;  %vm442_vm4 = vcmask 130048   ;;  %v429_v24 = vperm.slane %v4326_v7, 0 }
  0xcb   : > { %453 = vmatpush.bf16.msra.mxu0 %v3299_v22 }
  0xce   : > { %3300 = vmatmul.msk.bf16.vlgmr.msra.gmra.mxu0 %vm442_vm4, %v3653_v23 }
 0x14b   : > { %v455_v25 = vpop.f32.mrf.mxu0 }
 0x14c   : > { %v456_v26 = vadd.f32 %v455_v25, %v429_v24 }
 0x14e   : > { %vm460_vm5 = vcmp.ge.f32.partialorder %v456_v26, 0.0  ;;  %v462_v27 = vmul.f32 0.1, %v456_v26 }
 0x150   : > { %v464_v28 = vsel %vm460_vm5, %v456_v26, %v462_v27 }
 0x151   : > { %v466_v29 = vpack.c.bf16 %v464_v28, %v464_v28 }
 0x153   : > { %468 = vst.msk [vmem:[#allocation2 + $0x70] sm:$0xf] %vm336_vm0, %v466_v29  ;;  %v457_v30 = vpop.f32.mrf.mxu0 }
 0x154   : > { %v458_v31 = vadd.f32 %v457_v30, %v429_v24 }
 0x156   : > { %vm461_vm6 = vcmp.ge.f32.partialorder %v458_v31, 0.0  ;;  %v463_v32 = vmul.f32 0.1, %v458_v31 }
 0x158   : > { %v465_v33 = vsel %vm461_vm6, %v458_v31, %v463_v32 }
 0x159   : > { %v467_v34 = vpack.c.bf16 %v465_v33, %v465_v33 }
 0x15b   : > { %469 = vst.msk [vmem:[#allocation2 + $0x74] sm:$0xf] %vm336_vm0, %v467_v34 }
 0x15c PF: > { %v3308_v35 = vor.u32 %v4304_v4, %v4285_v0  ;;  %v3654_v36 = vld [vmem:[%s4337_s14] sm:$0xff]  ;;  %v3655_v37 = vld [vmem:[%s4337_s14 + $0x8] sm:$0xff]  ;;  %vm486_vm7 = vcmask 130048   ;;  %v3656_v38 = vld [vmem:[%s4337_s14 + $0x10] sm:$0xff]  ;;  %vm884_vm8 = vcmask 1043456   ;;  %vm847_vm9 = vcmask 64512  }
 0x15d   : > { %v3657_v39 = vld [vmem:[%s4337_s14 + $0x18] sm:$0xff]  ;;  %v3359_v40 = vld [vmem:[%s5045_s4 + $0x4] sm:$0xf]  ;;  %v3659_v43 = vld [vmem:[%s4337_s14 + $0x28] sm:$0xff]  ;;  %v4420_v51 = vperm.slane %v4326_v7, 0 }
 0x15e   : > { %497 = vmatpush.bf16.msra.mxu0 %v3308_v35  ;;  %532 = vmatpush.bf16.msra.mxu1 %v3308_v35  ;;  %v886_v41 = vsel %vm884_vm8, %v3359_v40, 0  ;;  %v3658_v42 = vld [vmem:[%s4337_s14 + $0x20] sm:$0xff]  ;;  %v3660_v44 = vld [vmem:[%s4337_s14 + $0x30] sm:$0xff]  ;;  %v3661_v45 = vld [vmem:[%s4337_s14 + $0x38] sm:$0xff] }
 0x15f   : > { %567 = vmatpush.bf16.msra.mxu2 %v3308_v35  ;;  %602 = vmatpush.bf16.msra.mxu3 %v3308_v35  ;;  %v4410_v46 = vld [vmem:[#allocation2 + $0x4] sm:$0xf]  ;;  %v4412_v47 = vld [vmem:[#allocation2 + $0x8] sm:$0xff]   ;;  %v784_v16 = vld [vmem:[%s5045_s4] sm:$0xf] }
 0x160   : > { %v3700_v48 = vunpack.c.l.b16 %v4412_v47  ;;  %v811_v49 = vunpack.c.l.b16 %v4410_v46  ;;  %v3384_v4 = vld [vmem:[%s5045_s4 + $0x8] sm:$0xf]  ;;  %v3445_v15 = vld [vmem:[%s5045_s4 + $0xc] sm:$0xf]  ;;  %v3458_v17 = vld [vmem:[%s5045_s4 + $0x10] sm:$0xf] }
 0x161   : > { %3309 = vmatmul.msk.bf16.vlgmr.msra.gmra.mxu0 %vm486_vm7, %v3654_v36  ;;  %3316 = vmatmul.msk.bf16.vlgmr.msra.gmra.mxu1 %vm486_vm7, %v3655_v37  ;;  %v1409_v7 = vsel %vm884_vm8, %v3384_v4, 0  ;;  %v1731_v24 = vsel %vm884_vm8, %v3445_v15, 0  ;;  %v1118_v25 = vsel %vm884_vm8, %v784_v16, 0  ;;  %v1861_v29 = vsel %vm884_vm8, %v3458_v17, 0 }
 0x162   : > { %672 = vmatpush.bf16.msrb.mxu1 %v3308_v35  ;;  %637 = vmatpush.bf16.msrb.mxu0 %v3308_v35  ;;  %v835_v50 = vpack.c.b16 %v3700_v48, %v811_v49 }
 0x163   : > { %3323 = vmatmul.msk.bf16.vlgmr.msra.gmra.mxu2 %vm486_vm7, %v3656_v38  ;;  %3330 = vmatmul.msk.bf16.vlgmr.msra.gmra.mxu3 %vm486_vm7, %v3657_v39 }
 0x164   : > { %707 = vmatpush.bf16.msrb.mxu2 %v3308_v35  ;;  %742 = vmatpush.bf16.msrb.mxu3 %v3308_v35 }
 0x166   : > { %895 = vmatpush.bf16.msra.mxu0 %v886_v41  ;;  %4086 = vmatpush.bf16.msra.mxu1 %v886_v41 }
 0x168   : > { %4087 = vmatpush.bf16.msra.mxu2 %v886_v41  ;;  %4088 = vmatpush.bf16.msra.mxu3 %v886_v41 }
 0x171   : > { %3337 = vmatmul.msk.bf16.vlgmr.msrb.gmra.mxu0 %vm486_vm7, %v3658_v42  ;;  %3344 = vmatmul.msk.bf16.vlgmr.msrb.gmra.mxu1 %vm486_vm7, %v3659_v43 }
 0x172   : > { %1127 = vmatpush.bf16.msrb.mxu1 %v1118_v25  ;;  %1870 = vmatpush.bf16.msrb.mxu0 %v1861_v29  ;;  %v759_v25 = vld [vmem:[#allocation2] sm:$0x8] }
 0x173   : > { %3351 = vmatmul.msk.bf16.vlgmr.msrb.gmra.mxu2 %vm486_vm7, %v3660_v44  ;;  %3358 = vmatmul.msk.bf16.vlgmr.msrb.gmra.mxu3 %vm486_vm7, %v3661_v45 }
 0x174   : > { %1418 = vmatpush.bf16.msrb.mxu2 %v1409_v7  ;;  %1740 = vmatpush.bf16.msrb.mxu3 %v1731_v24 }
 0x181   : > { %3360 = vmatmul.msk.bf16.vlgmr.msra.gmra.mxu0 %vm847_vm9, %v835_v50 }
 0x1de   : > { %v499_v52 = vpop.f32.mrf.mxu0  ;;  %v534_v53 = vpop.f32.mrf.mxu1 }
 0x1df   : > { %v500_v54 = vadd.f32 %v499_v52, %v4420_v51  ;;  %v535_v55 = vadd.f32 %v534_v53, %v4420_v51 }
 0x1e1   : > { %vm504_vm10 = vcmp.ge.f32.partialorder %v500_v54, 0.0  ;;  %v506_v56 = vmul.f32 0.1, %v500_v54  ;;  %vm539_vm11 = vcmp.ge.f32.partialorder %v535_v55, 0.0  ;;  %v541_v57 = vmul.f32 0.1, %v535_v55 }
 0x1e3   : > { %v508_v58 = vsel %vm504_vm10, %v500_v54, %v506_v56  ;;  %v543_v59 = vsel %vm539_vm11, %v535_v55, %v541_v57 }
 0x1e4   : > { %v510_v60 = vpack.c.bf16 %v508_v58, %v508_v58  ;;  %v545_v61 = vpack.c.bf16 %v543_v59, %v543_v59 }
 0x1e6   : > { %v569_v62 = vpop.f32.mrf.mxu2  ;;  %v604_v63 = vpop.f32.mrf.mxu3  ;;  %512 = vst.msk [vmem:[#allocation2 + $0x10] sm:$0xf] %vm336_vm0, %v510_v60 }
 0x1e7   : > { %v570_v0 = vadd.f32 %v569_v62, %v4420_v51  ;;  %v605_v1 = vadd.f32 %v604_v63, %v4420_v51  ;;  %v501_v2 = vpop.f32.mrf.mxu0  ;;  %v536_v3 = vpop.f32.mrf.mxu1  ;;  %547 = vst.msk [vmem:[#allocation2 + $0x1c] sm:$0xf] %vm336_vm0, %v545_v61 }
 0x1e8   : > { %v502_v5 = vadd.f32 %v501_v2, %v4420_v51  ;;  %v537_v6 = vadd.f32 %v536_v3, %v4420_v51 }
 0x1e9   : > { %vm574_vm12 = vcmp.ge.f32.partialorder %v570_v0, 0.0  ;;  %v576_v9 = vmul.f32 0.1, %v570_v0  ;;  %vm609_vm13 = vcmp.ge.f32.partialorder %v605_v1, 0.0  ;;  %v611_v10 = vmul.f32 0.1, %v605_v1 }
 0x1ea   : > { %vm505_vm14 = vcmp.ge.f32.partialorder %v502_v5, 0.0  ;;  %v507_v11 = vmul.f32 0.1, %v502_v5  ;;  %vm540_vm15 = vcmp.ge.f32.partialorder %v537_v6, 0.0  ;;  %v542_v12 = vmul.f32 0.1, %v537_v6 }
 0x1eb   : > { %v578_v13 = vsel %vm574_vm12, %v570_v0, %v576_v9  ;;  %v613_v14 = vsel %vm609_vm13, %v605_v1, %v611_v10 }
 0x1ec   : > { %v580_v18 = vpack.c.bf16 %v578_v13, %v578_v13  ;;  %v615_v19 = vpack.c.bf16 %v613_v14, %v613_v14  ;;  %v509_v20 = vsel %vm505_vm14, %v502_v5, %v507_v11  ;;  %v544_v21 = vsel %vm540_vm15, %v537_v6, %v542_v12 }
 0x1ed   : > { %v511_v22 = vpack.c.bf16 %v509_v20, %v509_v20  ;;  %v546_v23 = vpack.c.bf16 %v544_v21, %v544_v21  ;;  %v4091_v28 = vld [vmem:[#allocation2 + $0xc] sm:$0xff]  }
 0x1ee   : > { %582 = vst.msk [vmem:[#allocation2 + $0x28] sm:$0xf] %vm336_vm0, %v580_v18  ;;  %v571_v26 = vpop.f32.mrf.mxu2  ;;  %v606_v27 = vpop.f32.mrf.mxu3  ;;  %3361 = vmatmul.msk.bf16.gmra.mxu0 %vm847_vm9, %v4091_v28  ;;  %v950_v28 = vunpack.c.l.b16 %v759_v25 }
 0x1ef   : > { %617 = vst.msk [vmem:[#allocation2 + $0x34] sm:$0xf] %vm336_vm0, %v615_v19  ;;  %v572_v30 = vadd.f32 %v571_v26, %v4420_v51  ;;  %v607_v31 = vadd.f32 %v606_v27, %v4420_v51  ;;  %v639_v32 = vpop.f32.mrf.mxu0  ;;  %v674_v33 = vpop.f32.mrf.mxu1  ;;  %v3532_v26 = vld [vmem:[%s5045_s4 + $0x18] sm:$0xf] }
 0x1f0   : > { %513 = vst.msk [vmem:[#allocation2 + $0x14] sm:$0xf] %vm336_vm0, %v511_v22  ;;  %v640_v34 = vadd.f32 %v639_v32, %v4420_v51  ;;  %v675_v35 = vadd.f32 %v674_v33, %v4420_v51  ;;  %v2489_v27 = vsel %vm884_vm8, %v3532_v26, 0  ;;  %v3545_v32 = vld [vmem:[%s5045_s4 + $0x1c] sm:$0xf] }
 0x1f1   : > { %548 = vst.msk [vmem:[#allocation2 + $0x20] sm:$0xf] %vm336_vm0, %v546_v23  ;;  %vm575_vm1 = vcmp.ge.f32.partialorder %v572_v30, 0.0  ;;  %v577_v36 = vmul.f32 0.1, %v572_v30  ;;  %vm610_vm2 = vcmp.ge.f32.partialorder %v607_v31, 0.0 }
 0x1f2   : > { %v612_v37 = vmul.f32 0.1, %v607_v31  ;;  %vm644_vm3 = vcmp.ge.f32.partialorder %v640_v34, 0.0  ;;  %v646_v38 = vmul.f32 0.1, %v640_v34  ;;  %vm679_vm4 = vcmp.ge.f32.partialorder %v675_v35, 0.0 }
 0x1f3   : > { %v579_v39 = vsel %vm575_vm1, %v572_v30, %v577_v36  ;;  %v681_v40 = vmul.f32 0.1, %v675_v35  ;;  %v951_v30 = vpack.c.b16 %v811_v49, %v950_v28  ;;  %v3471_v33 = vld [vmem:[%s5045_s4 + $0x14] sm:$0xf]  ;;  %v2619_v36 = vsel %vm884_vm8, %v3545_v32, 0 }
 0x1f4   : > { %v581_v41 = vpack.c.bf16 %v579_v39, %v579_v39  ;;  %v614_v42 = vsel %vm610_vm2, %v607_v31, %v612_v37  ;;  %v648_v43 = vsel %vm644_vm3, %v640_v34, %v646_v38  ;;  %v2167_v46 = vsel %vm884_vm8, %v3471_v33, 0  ;;  %v4499_v39 = vld [vmem:[#allocation2 + $0x18] sm:$0xff]  }
 0x1f5   : > { %v616_v44 = vpack.c.bf16 %v614_v42, %v614_v42  ;;  %v650_v45 = vpack.c.bf16 %v648_v43, %v648_v43  ;;  %v683_v48 = vsel %vm679_vm4, %v675_v35, %v681_v40  ;;  %v4097_v22 = vld [vmem:[#allocation2 + $0x24] sm:$0xff]   ;;  %v966_v34 = vshrl.u32 %v951_v30, 16  ;;  %v3558_v43 = vld [vmem:[%s5045_s4 + $0x20] sm:$0xf] }
 0x1f6   : > { %583 = vst.msk [vmem:[#allocation2 + $0x2c] sm:$0xf] %vm336_vm0, %v581_v41  ;;  %v685_v50 = vpack.c.bf16 %v683_v48, %v683_v48  ;;  %v709_v52 = vpop.f32.mrf.mxu2  ;;  %v744_v53 = vpop.f32.mrf.mxu3  ;;  %v969_v35 = vshll.u32 %v951_v30, 16  ;;  %v974_v49 = vshrl.u32 %v4412_v47, 16  ;;  %v977_v37 = vshll.u32 %v4412_v47, 16  ;;  %v3662_v42 = vld [vmem:[#allocation2 + $0x4] sm:$0xff] }
 0x1f7   : > { %618 = vst.msk [vmem:[#allocation2 + $0x38] sm:$0xf] %vm336_vm0, %v616_v44  ;;  %v710_v54 = vadd.f32 %v709_v52, %v4420_v51  ;;  %v641_v55 = vpop.f32.mrf.mxu0  ;;  %v676_v56 = vpop.f32.mrf.mxu1  ;;  %v745_v57 = vadd.f32 %v744_v53, %v4420_v51  ;;  %v4093_v5 = vld [vmem:[#allocation2 + $0x14] sm:$0xff]   ;;  %v968_v40 = vrot.slane %v966_v34, 3  ;;  %v2925_v48 = vsel %vm884_vm8, %v3558_v43, 0 }
 0x1f8   : > { %652 = vst.msk [vmem:[#allocation2 + $0x40] sm:$0xf] %vm336_vm0, %v650_v45  ;;  %v642_v58 = vadd.f32 %v641_v55, %v4420_v51  ;;  %v677_v59 = vadd.f32 %v676_v56, %v4420_v51  ;;  %v4095_v60 = vld [vmem:[#allocation2 + $0x1c] sm:$0xff]   ;;  %v4476_v24 = vld [vmem:[#allocation2 + $0x10] sm:$0xff]   ;;  %v971_v41 = vrot.slane %v969_v35, 4  ;;  %v976_v44 = vrot.slane %v974_v49, 3  ;;  %2934 = vmatpush.bf16.msra.mxu0 %v2925_v48 }
 0x1f9   : > { %687 = vst.msk [vmem:[#allocation2 + $0x4c] sm:$0xf] %vm336_vm0, %v685_v50  ;;  %vm714_vm5 = vcmp.ge.f32.partialorder %v710_v54, 0.0  ;;  %v716_v61 = vmul.f32 0.1, %v710_v54  ;;  %vm749_vm6 = vcmp.ge.f32.partialorder %v745_v57, 0.0  ;;  %3363 = vmatmul.msk.bf16.vlgmr.msra.gmra.mxu1 %vm847_vm9, %v4095_v60 }
 0x1fa   : > { %vm645_vm10 = vcmp.ge.f32.partialorder %v642_v58, 0.0  ;;  %v647_v62 = vmul.f32 0.1, %v642_v58  ;;  %vm680_vm11 = vcmp.ge.f32.partialorder %v677_v59, 0.0  ;;  %v682_v63 = vmul.f32 0.1, %v677_v59  ;;  %2176 = vmatpush.bf16.msra.mxu1 %v2167_v46 }
 0x1fb   : > { %v718_v0 = vsel %vm714_vm5, %v710_v54, %v716_v61  ;;  %v751_v1 = vmul.f32 0.1, %v745_v57  ;;  %v979_v45 = vrot.slane %v977_v37, 4  ;;  %v783_v50 = vld [vmem:[#allocation2 + $0x60] sm:$0xf]  ;;  %v972_v53 = vor.u32 %v971_v41, %v968_v40 }
 0x1fc   : > { %v720_v2 = vpack.c.bf16 %v718_v0, %v718_v0  ;;  %v649_v3 = vsel %vm645_vm10, %v642_v58, %v647_v62  ;;  %v684_v4 = vsel %vm680_vm11, %v677_v59, %v682_v63  ;;  %v1275_v54 = vshll.u32 %v3662_v42, 16  ;;  %v4009_v58 = vld [vmem:[#allocation2 + $0xc] sm:$0x8]  ;;  %v4110_v59 = vld [vmem:[#allocation2 + $0xc] sm:$0xf0]   ;;  %v4114_v26 = vld [vmem:[#allocation2 + $0x1c] sm:$0xff]  }
 0x1fd   : > { %v651_v6 = vpack.c.bf16 %v649_v3, %v649_v3  ;;  %v686_v7 = vpack.c.bf16 %v684_v4, %v684_v4  ;;  %v753_v9 = vsel %vm749_vm6, %v745_v57, %v751_v1  ;;  %v4099_v31 = vld [vmem:[#allocation2 + $0x2c] sm:$0xff]   ;;  %v4511_v55 = vunpack.c.l.b16 %v783_v50  ;;  %v3665_v40 = vld [vmem:[#allocation2 + $0x1c] sm:$0xff] }
 0x1fe   : > { %722 = vst.msk [vmem:[#allocation2 + $0x58] sm:$0xf] %vm336_vm0, %v720_v2  ;;  %v711_v10 = vpop.f32.mrf.mxu2  ;;  %v755_v11 = vpack.c.bf16 %v753_v9, %v753_v9  ;;  %v4101_v12 = vld [vmem:[#allocation2 + $0x34] sm:$0xff]   ;;  %v746_v13 = vpop.f32.mrf.mxu3  ;;  %3362 = vmatmul.msk.bf16.gmra.mxu0 %vm847_vm9, %v4093_v5  ;;  %v980_v56 = vor.u32 %v979_v45, %v976_v44  ;;  %v3663_v57 = vld [vmem:[#allocation2 + $0xc] sm:$0xff]  ;;  %v1273_v62 = vshrl.u32 %v3662_v42, 16  ;;  %v1277_v63 = vrot.slane %v1275_v54, 1 }
 0x1ff   : > { %653 = vst.msk [vmem:[#allocation2 + $0x44] sm:$0xf] %vm336_vm0, %v651_v6  ;;  %v712_v14 = vadd.f32 %v711_v10, %v4420_v51  ;;  %v747_v15 = vadd.f32 %v746_v13, %v4420_v51  ;;  %3366 = vmatmul.msk.bf16.vlgmr.msra.gmra.mxu2 %vm847_vm9, %v4101_v12  ;;  %v4103_v23 = vld [vmem:[#allocation2 + $0x3c] sm:$0xff]   ;;  %v4010_v0 = vor.u32 %v4110_v59, %v4009_v58  ;;  %v1280_v1 = vshll.u32 %v3663_v57, 16  ;;  %v4112_v2 = vld [vmem:[#allocation2 + $0x14] sm:$0xff]   ;;  %v3880_v33 = vld [vmem:[#allocation2 + $0x28] sm:$0xff]  }
 0x200   : > { %688 = vst.msk [vmem:[#allocation2 + $0x50] sm:$0xf] %vm336_vm0, %v686_v7  ;;  %2498 = vmatpush.bf16.msra.mxu2 %v2489_v27  ;;  %v1278_v3 = vor.u32 %v1277_v63, %v1273_v62  ;;  %vm1271_vm8 = vsmask.f32 7424  ;;  %v1587_v7 = vshrl.u32 %v4112_v2, 16  ;;  %v1590_v9 = vshll.u32 %v4112_v2, 16 }
 0x201   : > { %vm715_vm12 = vcmp.ge.f32.partialorder %v712_v14, 0.0  ;;  %v717_v16 = vmul.f32 0.1, %v712_v14  ;;  %757 = vst.msk [vmem:[#allocation2 + $0x64] sm:$0xf] %vm336_vm0, %v755_v11  ;;  %vm750_vm13 = vcmp.ge.f32.partialorder %v747_v15, 0.0 }
 0x202   : > { %v752_v17 = vmul.f32 0.1, %v747_v15  ;;  %v1579_v4 = vshrl.u32 %v4010_v0, 16  ;;  %v1582_v5 = vshll.u32 %v4010_v0, 16  ;;  %v1282_v6 = vrot.slane %v1280_v1, 1  ;;  %v4518_v11 = vld [vmem:[#allocation2 + $0x20] sm:$0xff]  }
 0x203   : > { %v719_v18 = vsel %vm715_vm12, %v712_v14, %v717_v16  ;;  %v983_v12 = vshrl.u32 %v4476_v24, 16  ;;  %v986_v13 = vshll.u32 %v4476_v24, 16  ;;  %v1589_v16 = vrot.slane %v1587_v7, 3  ;;  %v4116_v44 = vld [vmem:[#allocation2 + $0x24] sm:$0xff]   ;;  %v3881_v58 = vld [vmem:[#allocation2 + $0x30] sm:$0xff]  }
 0x204   : > { %v721_v19 = vpack.c.bf16 %v719_v18, %v719_v18  ;;  %v754_v20 = vsel %vm750_vm13, %v747_v15, %v752_v17  ;;  %v1283_v10 = vsel %vm1271_vm8, %v1278_v3, %v1282_v6  ;;  %v1581_v14 = vrot.slane %v1579_v4, 3  ;;  %v3666_v63 = vld [vmem:[#allocation2 + $0x24] sm:$0xff]  ;;  %v4118_v7 = vld [vmem:[#allocation2 + $0x2c] sm:$0xff]  }
 0x205   : > { %v756_v21 = vpack.c.bf16 %v754_v20, %v754_v20  ;;  %v4108_v29 = vld [vmem:[#allocation2 + $0x54] sm:$0xff]   ;;  %v1584_v15 = vrot.slane %v1582_v5, 4  ;;  %v1592_v17 = vrot.slane %v1590_v9, 4  ;;  %v985_v18 = vrot.slane %v983_v12, 3  ;;  %v4549_v5 = vpop.f32.mrf.mxu0 }
 0x206   : > { %723 = vst.msk [vmem:[#allocation2 + $0x5c] sm:$0xf] %vm336_vm0, %v721_v19  ;;  %v4105_v38 = vld [vmem:[#allocation2 + $0x44] sm:$0xff]   ;;  %v988_v19 = vrot.slane %v986_v13, 4  ;;  %v1599_v30 = vshll.u32 %v4114_v26, 16  ;;  %v992_v34 = vshrl.u32 %v4499_v39, 16 }
 0x207   : > { %758 = vst.msk [vmem:[#allocation2 + $0x68] sm:$0xf] %vm336_vm0, %v756_v21  ;;  %v4107_v51 = vld [vmem:[#allocation2 + $0x4c] sm:$0xff]   ;;  %vm964_vm0 = vsmask.f32 4352  ;;  %v1585_v20 = vor.u32 %v1584_v15, %v1581_v14  ;;  %v3664_v21 = vld [vmem:[#allocation2 + $0x14] sm:$0xff] }
 0x208   : > { %3369 = vmatmul.msk.bf16.vlgmr.msra.gmra.mxu3 %vm847_vm9, %v4107_v51  ;;  %v981_v61 = vsel %vm964_vm0, %v972_v53, %v980_v56  ;;  %v1593_v51 = vor.u32 %v1592_v17, %v1589_v16  ;;  %v1288_v27 = vshll.u32 %v3664_v21, 16  ;;  %v995_v35 = vshll.u32 %v4499_v39, 16  ;;  %v3882_v17 = vld [vmem:[#allocation2 + $0x38] sm:$0xff]  }
 0x209   : > { %3364 = vmatmul.msk.bf16.gmra.mxu1 %vm847_vm9, %v4097_v22  ;;  %2628 = vmatpush.bf16.msra.mxu3 %v2619_v36  ;;  %v989_v22 = vor.u32 %v988_v19, %v985_v18  ;;  %v1601_v46 = vrot.slane %v1599_v30, 4  ;;  %v994_v49 = vrot.slane %v992_v34, 3  ;;  %v1292_v42 = vshrl.u32 %v3664_v21, 16 }
 0x20a   : > { %v1594_v25 = vsel %vm964_vm0, %v1585_v20, %v1593_v51  ;;  %v997_v37 = vrot.slane %v995_v35, 4  ;;  %v1605_v50 = vshrl.u32 %v4116_v44, 16  ;;  %v1001_v54 = vshrl.u32 %v4518_v11, 16 }
 0x20b   : > { %v1304_v2 = vshll.u32 %v3666_v63, 16  ;;  %v1010_v12 = vshrl.u32 %v3880_v33, 16  ;;  %v1013_v13 = vshll.u32 %v3880_v33, 16  ;;  %v1614_v14 = vshrl.u32 %v4118_v7, 16 }
 0x20c   : > { %v998_v41 = vor.u32 %v997_v37, %v994_v49  ;;  %v1607_v59 = vrot.slane %v1605_v50, 3  ;;  %v1617_v15 = vshll.u32 %v4118_v7, 16  ;;  %v1022_v49 = vshll.u32 %v3881_v58, 16 }
 0x20d   : > { %v4508_v47 = vld [vmem:[#allocation2 + $0x58] sm:$0xff]   ;;  %v1012_v18 = vrot.slane %v1010_v12, 3  ;;  %v1015_v19 = vrot.slane %v1013_v13, 4  ;;  %v1616_v20 = vrot.slane %v1614_v14, 3 }
 0x20e   : > { %3459 = vmatmul.msk.bf16.vlgmr.msrb.gmra.mxu0 %vm847_vm9, %v4476_v24  ;;  %v3741_v52 = vunpack.c.h.b16 %v4508_v47  ;;  %v990_v24 = vsel %vm964_vm0, %v980_v56, %v989_v22  ;;  %v999_v45 = vsel %vm964_vm0, %v989_v22, %v998_v41  ;;  %v1004_v56 = vshll.u32 %v4518_v11, 16 }
 0x20f   : > { %3367 = vmatmul.msk.bf16.gmra.mxu2 %vm847_vm9, %v4103_v23  ;;  %v1284_v23 = vshrl.u32 %v3663_v57, 16  ;;  %v1619_v21 = vrot.slane %v1617_v15, 4  ;;  %v1016_v22 = vor.u32 %v1015_v19, %v1012_v18 }
 0x210   : > { %v846_v60 = vpack.c.b16 %v4511_v55, %v3741_v52  ;;  %v1608_v52 = vshll.u32 %v4116_v44, 16  ;;  %v1006_v62 = vrot.slane %v1004_v56, 4  ;;  %v3668_v44 = vld [vmem:[#allocation2 + $0x34] sm:$0xff] }
 0x211   : > { %v1286_v28 = vor.u32 %v1284_v23, %v1282_v6  ;;  %v1300_v6 = vshrl.u32 %v3665_v40, 16  ;;  %v3667_v23 = vld [vmem:[#allocation2 + $0x2c] sm:$0xff]  ;;  %v1324_v19 = vshrl.u32 %v3668_v44, 16 }
 0x218   : > { %3370 = vmatmul.msk.bf16.gmra.mxu3 %vm847_vm9, %v4108_v29  ;;  %v1596_v29 = vshrl.u32 %v4114_v26, 16  ;;  %v1308_v26 = vshrl.u32 %v3666_v63, 16 }
 0x219   : > { %3365 = vmatmul.msk.bf16.gmra.mxu1 %vm847_vm9, %v4099_v31  ;;  %v1290_v31 = vrot.slane %v1288_v27, 1  ;;  %v4120_v27 = vld [vmem:[#allocation2 + $0x34] sm:$0xff]  }
 0x21a   : > { %v1598_v36 = vrot.slane %v1596_v29, 3  ;;  %v1312_v29 = vshll.u32 %v3667_v23, 16 }
 0x21b   : > { %v1291_v32 = vsel %vm1271_vm8, %v1286_v28, %v1290_v31  ;;  %v1294_v48 = vor.u32 %v1292_v42, %v1290_v31  ;;  %v1623_v31 = vshrl.u32 %v4120_v27, 16 }
 0x21c   : > { %v1314_v34 = vrot.slane %v1312_v29, 1 }
 0x21d   : > { %v1625_v37 = vrot.slane %v1623_v31, 3 }
 0x21e   : > { %3460 = vmatmul.msk.bf16.gmra.mxu0 %vm847_vm9, %v4499_v39  ;;  %v1296_v39 = vshll.u32 %v3665_v40, 16 }
 0x21f   : > { %3368 = vmatmul.msk.bf16.gmra.mxu2 %vm847_vm9, %v4105_v38  ;;  %v1602_v38 = vor.u32 %v1601_v46, %v1598_v36  ;;  %v4566_v36 = vld [vmem:[#allocation2 + $0x40] sm:$0xff]   ;;  %v1019_v46 = vshrl.u32 %v3881_v58, 16 }
 0x220   : > { %v1298_v53 = vrot.slane %v1296_v39, 1 }
 0x221   : > { %v1603_v43 = vsel %vm964_vm0, %v1593_v51, %v1602_v38  ;;  %v4555_v51 = vpop.f32.mrf.mxu0  ;;  %v1021_v40 = vrot.slane %v1019_v46, 3 }
 0x222   : > { %v1299_v57 = vsel %vm1271_vm8, %v1294_v48, %v1298_v53  ;;  %v1302_v9 = vor.u32 %v1300_v6, %v1298_v53  ;;  %v1316_v48 = vshrl.u32 %v3667_v23, 16 }
 0x224   : > { %v1318_v56 = vor.u32 %v1316_v48, %v1314_v34 }
 0x228   : > { %3371 = vmatmul.msk.bf16.gmra.mxu3 %vm847_vm9, %v846_v60  ;;  %v1610_v60 = vrot.slane %v1608_v52, 4  ;;  %v4122_v52 = vld [vmem:[#allocation2 + $0x3c] sm:$0xff]  }
 0x229   : > { %3372 = vmatmul.msk.bf16.vlgmr.msrb.gmra.mxu1 %vm847_vm9, %v981_v61  ;;  %v1003_v61 = vrot.slane %v1001_v54, 3  ;;  %v1320_v54 = vshll.u32 %v3668_v44, 16 }
 0x22a   : > { %v1611_v0 = vor.u32 %v1610_v60, %v1607_v59 }
 0x22b   : > { %v4543_v1 = vor.u32 %v1006_v62, %v1003_v61  ;;  %v1322_v60 = vrot.slane %v1320_v54, 1  ;;  %v1028_v61 = vshrl.u32 %v3882_v17, 16  ;;  %v1031_v62 = vshll.u32 %v3882_v17, 16 }
 0x22c   : > { %v1612_v3 = vsel %vm964_vm0, %v1602_v38, %v1611_v0 }
 0x22d   : > { %v1008_v4 = vsel %vm964_vm0, %v998_v41, %v4543_v1  ;;  %v4560_v28 = vsel %vm964_vm0, %v4543_v1, %v1016_v22  ;;  %v1024_v41 = vrot.slane %v1022_v49, 4  ;;  %v1030_v6 = vrot.slane %v1028_v61, 3 }
 0x22e   : > { %3461 = vmatmul.msk.bf16.gmra.mxu0 %vm847_vm9, %v4518_v11  ;;  %v1033_v7 = vrot.slane %v1031_v62, 4 }
 0x22f   : > { %3433 = vmatmul.msk.bf16.vlgmr.msrb.gmra.mxu2 %vm847_vm9, %v1283_v10  ;;  %v1306_v10 = vrot.slane %v1304_v2, 1  ;;  %v1025_v39 = vor.u32 %v1024_v41, %v1021_v40  ;;  %v4587_v2 = vld [vmem:[#allocation2 + $0x48] sm:$0xff]  }
 0x230   : > { %v1034_v14 = vor.u32 %v1033_v7, %v1030_v6  ;;  %v3670_v41 = vld [vmem:[#allocation2 + $0x44] sm:$0xff]  ;;  %v1046_v6 = vshrl.u32 %v4587_v2, 16  ;;  %v1049_v7 = vshll.u32 %v4587_v2, 16 }
 0x231   : > { %v1307_v16 = vsel %vm1271_vm8, %v1302_v9, %v1306_v10  ;;  %v1310_v30 = vor.u32 %v1308_v26, %v1306_v10  ;;  %v4577_v53 = vsel %vm964_vm0, %v1016_v22, %v1025_v39  ;;  %v3669_v10 = vld [vmem:[#allocation2 + $0x3c] sm:$0xff]  ;;  %v1326_v22 = vor.u32 %v1324_v19, %v1322_v60 }
 0x232   : > { %v4596_v18 = vsel %vm964_vm0, %v1025_v39, %v1034_v14  ;;  %v1332_v39 = vshrl.u32 %v3669_v10, 16  ;;  %v1336_v54 = vshll.u32 %v3670_v41, 16 }
 0x233   : > { %v1315_v35 = vsel %vm1271_vm8, %v1310_v30, %v1314_v34 }
 0x238   : > { %3446 = vmatmul.msk.bf16.vlgmr.msrb.gmra.mxu3 %vm847_vm9, %v1594_v25  ;;  %v1620_v25 = vor.u32 %v1619_v21, %v1616_v20  ;;  %v4124_v20 = vld [vmem:[#allocation2 + $0x44] sm:$0xff]  }
 0x239   : > { %3373 = vmatmul.msk.bf16.gmra.mxu1 %vm847_vm9, %v990_v24  ;;  %v1641_v29 = vshrl.u32 %v4124_v20, 16  ;;  %v1644_v30 = vshll.u32 %v4124_v20, 16  ;;  %v3671_v20 = vld [vmem:[#allocation2 + $0x4c] sm:$0xff] }
 0x23a   : > { %v1621_v24 = vsel %vm964_vm0, %v1611_v0, %v1620_v25  ;;  %v1323_v0 = vsel %vm1271_vm8, %v1318_v56, %v1322_v60 }
 0x23b   : > { %v1643_v46 = vrot.slane %v1641_v29, 3  ;;  %v1646_v49 = vrot.slane %v1644_v30, 4  ;;  %v1344_v30 = vshll.u32 %v3671_v20, 16 }
 0x23e   : > { %3462 = vmatmul.msk.bf16.gmra.mxu0 %vm847_vm9, %v3880_v33 }
 0x23f   : > { %3434 = vmatmul.msk.bf16.gmra.mxu2 %vm847_vm9, %v1291_v32  ;;  %v1626_v32 = vshll.u32 %v4120_v27, 16  ;;  %v1040_v27 = vshll.u32 %v4566_v36, 16 }
 0x241   : > { %v1628_v38 = vrot.slane %v1626_v32, 4 }
 0x243   : > { %v1629_v42 = vor.u32 %v1628_v38, %v1625_v37 }
 0x245   : > { %v1630_v50 = vsel %vm964_vm0, %v1620_v25, %v1629_v42 }
 0x248   : > { %3447 = vmatmul.msk.bf16.gmra.mxu3 %vm847_vm9, %v1603_v43 }
 0x249   : > { %3374 = vmatmul.msk.bf16.gmra.mxu1 %vm847_vm9, %v999_v45 }
 0x24e   : > { %3463 = vmatmul.msk.bf16.gmra.mxu0 %vm847_vm9, %v3881_v58  ;;  %v1635_v58 = vshll.u32 %v4122_v52, 16 }
 0x24f   : > { %3435 = vmatmul.msk.bf16.gmra.mxu2 %vm847_vm9, %v1299_v57  ;;  %v1632_v57 = vshrl.u32 %v4122_v52, 16 }
 0x258   : > { %3448 = vmatmul.msk.bf16.gmra.mxu3 %vm847_vm9, %v1612_v3  ;;  %v1634_v3 = vrot.slane %v1632_v57, 3 }
 0x259   : > { %3375 = vmatmul.msk.bf16.gmra.mxu1 %vm847_vm9, %v1008_v4  ;;  %v1637_v4 = vrot.slane %v1635_v58, 4 }
 0x25b   : > { %v1638_v12 = vor.u32 %v1637_v4, %v1634_v3 }
 0x25e   : > { %3464 = vmatmul.msk.bf16.gmra.mxu0 %vm847_vm9, %v3882_v17  ;;  %v1639_v17 = vsel %vm964_vm0, %v1629_v42, %v1638_v12  ;;  %v1647_v42 = vor.u32 %v1646_v49, %v1643_v46 }
 0x25f   : > { %3436 = vmatmul.msk.bf16.gmra.mxu2 %vm847_vm9, %v1307_v16  ;;  %v1328_v16 = vshll.u32 %v3669_v10, 16 }
 0x260   : > { %v1648_v48 = vsel %vm964_vm0, %v1638_v12, %v1647_v42 }
 0x261   : > { %v1330_v23 = vrot.slane %v1328_v16, 1 }
 0x263   : > { %v1331_v32 = vsel %vm1271_vm8, %v1326_v22, %v1330_v23  ;;  %v1334_v57 = vor.u32 %v1332_v39, %v1330_v23 }
 0x268   : > { %3449 = vmatmul.msk.bf16.gmra.mxu3 %vm847_vm9, %v1621_v24  ;;  %v1037_v24 = vshrl.u32 %v4566_v36, 16 }
 0x269   : > { %3376 = vmatmul.msk.bf16.gmra.mxu1 %vm847_vm9, %v4560_v28 }
 0x26a   : > { %v1039_v34 = vrot.slane %v1037_v24, 3 }
 0x26b   : > { %v902_v33 = vpop.f32.mrf.mxu0 }
 0x26c   : > { %v4612_v33 = vld [vmem:[#allocation2 + $0x50] sm:$0xff]  }
 0x26e   : > { %3465 = vmatmul.msk.bf16.gmra.mxu0 %vm847_vm9, %v4566_v36 }
 0x26f   : > { %3437 = vmatmul.msk.bf16.gmra.mxu2 %vm847_vm9, %v1315_v35  ;;  %v1042_v35 = vrot.slane %v1040_v27, 4  ;;  %v4128_v27 = vld [vmem:[#allocation2 + $0x54] sm:$0xff]  }
 0x270   : > { %v1659_v46 = vshrl.u32 %v4128_v27, 16  ;;  %v1662_v49 = vshll.u32 %v4128_v27, 16 }
 0x271   : > { %v1043_v40 = vor.u32 %v1042_v35, %v1039_v34 }
 0x273   : > { %v4571_v43 = vpop.f32.mrf.mxu0  ;;  %v4625_v52 = vsel %vm964_vm0, %v1034_v14, %v1043_v40  ;;  %v1048_v14 = vrot.slane %v1046_v6, 3 }
 0x276   : > { %v4573_v45 = vpop.f32.mrf.mxu1 }
 0x278   : > { %3450 = vmatmul.msk.bf16.gmra.mxu3 %vm847_vm9, %v1630_v50  ;;  %v4126_v50 = vld [vmem:[#allocation2 + $0x4c] sm:$0xff]  }
 0x279   : > { %3377 = vmatmul.msk.bf16.gmra.mxu1 %vm847_vm9, %v4577_v53  ;;  %v1650_v60 = vshrl.u32 %v4126_v50, 16  ;;  %v1653_v61 = vshll.u32 %v4126_v50, 16  ;;  %v3887_v50 = vld [vmem:[#allocation2 + $0x60] sm:$0xff]  }
 0x27b   : > { %v4582_v59 = vpop.f32.mrf.mxu0  ;;  %v1652_v10 = vrot.slane %v1650_v60, 3  ;;  %v1655_v12 = vrot.slane %v1653_v61, 4 }
 0x27e   : > { %v4584_v63 = vpop.f32.mrf.mxu1  ;;  %3466 = vmatmul.msk.bf16.gmra.mxu0 %vm847_vm9, %v4587_v2  ;;  %v1340_v2 = vshrl.u32 %v3670_v41, 16  ;;  %v1346_v41 = vrot.slane %v1344_v30, 1 }
 0x27f   : > { %3438 = vmatmul.msk.bf16.gmra.mxu2 %vm847_vm9, %v1323_v0  ;;  %v1338_v0 = vrot.slane %v1336_v54, 1  ;;  %v1661_v54 = vrot.slane %v1659_v46, 3 }
 0x281   : > { %v1339_v4 = vsel %vm1271_vm8, %v1334_v57, %v1338_v0  ;;  %v1342_v34 = vor.u32 %v1340_v2, %v1338_v0  ;;  %v1664_v57 = vrot.slane %v1662_v49, 4  ;;  %v3672_v0 = vld [vmem:[#allocation2 + $0x54] sm:$0xff] }
 0x282   : > { %v4592_v9 = vpop.f32.mrf.mxu2 }
 0x283   : > { %v908_v13 = vpop.f32.mrf.mxu0  ;;  %v1665_v6 = vor.u32 %v1664_v57, %v1661_v54 }
 0x286   : > { %v915_v15 = vpop.f32.mrf.mxu1 }
 0x287   : > { %v1051_v15 = vrot.slane %v1049_v7, 4 }
 0x288   : > { %3451 = vmatmul.msk.bf16.gmra.mxu3 %vm847_vm9, %v1639_v17  ;;  %v1656_v17 = vor.u32 %v1655_v12, %v1652_v10  ;;  %v1352_v12 = vshll.u32 %v3672_v0, 16 }
 0x289   : > { %3378 = vmatmul.msk.bf16.gmra.mxu1 %vm847_vm9, %v4596_v18  ;;  %v1052_v23 = vor.u32 %v1051_v15, %v1048_v14  ;;  %v4130_v15 = vld [vmem:[#allocation2 + $0x5c] sm:$0xff]  }
 0x28a   : > { %v4601_v21 = vpop.f32.mrf.mxu2  ;;  %v1657_v24 = vsel %vm964_vm0, %v1647_v42, %v1656_v17  ;;  %v1055_v42 = vshrl.u32 %v4612_v33, 16  ;;  %v1666_v14 = vsel %vm964_vm0, %v1656_v17, %v1665_v6  ;;  %v1354_v30 = vrot.slane %v1352_v12, 1 }
 0x28b   : > { %v4603_v25 = vpop.f32.mrf.mxu3  ;;  %v4605_v26 = vpop.f32.mrf.mxu0  ;;  %v4646_v29 = vsel %vm964_vm0, %v1043_v40, %v1052_v23  ;;  %v1058_v40 = vshll.u32 %v4612_v33, 16  ;;  %v1668_v46 = vshrl.u32 %v4130_v15, 16  ;;  %v1671_v17 = vshll.u32 %v4130_v15, 16 }
 0x28d   : > { %v1060_v60 = vrot.slane %v1058_v40, 4 }
 0x28e   : > { %v4609_v31 = vpop.f32.mrf.mxu1  ;;  %3467 = vmatmul.msk.bf16.gmra.mxu0 %vm847_vm9, %v4612_v33 }
 0x28f   : > { %3439 = vmatmul.msk.bf16.gmra.mxu2 %vm847_vm9, %v1331_v32 }
 0x292   : > { %v928_v37 = vpop.f32.mrf.mxu2 }
 0x293   : > { %v4617_v38 = vpop.f32.mrf.mxu3  ;;  %v4619_v36 = vpop.f32.mrf.mxu0 }
 0x296   : > { %v4621_v44 = vpop.f32.mrf.mxu1 }
 0x298   : > { %3452 = vmatmul.msk.bf16.gmra.mxu3 %vm847_vm9, %v1648_v48  ;;  %v1347_v48 = vsel %vm1271_vm8, %v1342_v34, %v1346_v41 }
 0x299   : > { %3379 = vmatmul.msk.bf16.gmra.mxu1 %vm847_vm9, %v4625_v52 }
 0x29a   : > { %v4630_v56 = vpop.f32.mrf.mxu2 }
 0x29b   : > { %v941_v58 = vpop.f32.mrf.mxu3  ;;  %v1877_v62 = vpop.f32.mrf.mxu0 }
 0x29c   : > { %v1057_v58 = vrot.slane %v1055_v42, 3 }
 0x29e   : > { %v921_v3 = vpop.f32.mrf.mxu1  ;;  %3468 = vmatmul.msk.bf16.gmra.mxu0 %vm847_vm9, %v4508_v47  ;;  %v4661_v7 = vor.u32 %v1060_v60, %v1057_v58  ;;  %v4684_v60 = vld [vmem:[#allocation2 + $0x24] sm:$0xff] }
 0x29f   : > { %3440 = vmatmul.msk.bf16.gmra.mxu2 %vm847_vm9, %v1339_v4 }
 0x2a0   : > { %v4666_v2 = vsel %vm964_vm0, %v1052_v23, %v4661_v7  ;;  %v1064_v23 = vshrl.u32 %v4508_v47, 16 }
 0x2a2   : > { %v4638_v13 = vpop.f32.mrf.mxu2  ;;  %v1066_v54 = vrot.slane %v1064_v23, 3 }
 0x2a3   : > { %v4640_v16 = vpop.f32.mrf.mxu3  ;;  %v4642_v19 = vpop.f32.mrf.mxu0 }
 0x2a6   : > { %v1129_v22 = vpop.f32.mrf.mxu1 }
 0x2a7   : > { %v1130_v61 = vadd.f32 %v1129_v22, %v4549_v5  ;;  %v1348_v5 = vshrl.u32 %v3671_v20, 16  ;;  %v1067_v20 = vshll.u32 %v4508_v47, 16 }
 0x2a8   : > { %3453 = vmatmul.msk.bf16.gmra.mxu3 %vm847_vm9, %v1657_v24 }
 0x2a9   : > { %3380 = vmatmul.msk.bf16.gmra.mxu1 %vm847_vm9, %v4646_v29  ;;  %v1350_v27 = vor.u32 %v1348_v5, %v1346_v41  ;;  %v1670_v41 = vrot.slane %v1668_v46, 3  ;;  %v1069_v57 = vrot.slane %v1067_v20, 4  ;;  %v2796_v5 = vshll.u32 %v4684_v60, 16 }
 0x2aa   : > { %v934_v32 = vpop.f32.mrf.mxu2 }
 0x2ab   : > { %v4651_v35 = vpop.f32.mrf.mxu3  ;;  %v4653_v37 = vpop.f32.mrf.mxu0 }
 0x2ae   : > { %v1131_v39 = vpop.f32.mrf.mxu1  ;;  %3469 = vmatmul.msk.bf16.gmra.mxu0 %vm847_vm9, %v3887_v50  ;;  %v1673_v50 = vrot.slane %v1671_v17, 4 }
 0x2af   : > { %3441 = vmatmul.msk.bf16.gmra.mxu2 %vm847_vm9, %v1347_v48  ;;  %v1132_v22 = vadd.f32 %v1131_v39, %v4555_v51  ;;  %v1355_v51 = vsel %vm1271_vm8, %v1350_v27, %v1354_v30  ;;  %v4679_v39 = vld [vmem:[#allocation2 + $0x68] sm:$0xff]   ;;  %v3686_v48 = vld [vmem:[#allocation2 + $0x1c] sm:$0xff]  ;;  %v963_v27 = vpack.c.b16 %v4511_v55, %v4511_v55 }
 0x2b0   : > { %v2789_v46 = vshrl.u32 %v3686_v48, 16 }
 0x2b2   : > { %v1420_v62 = vpop.f32.mrf.mxu2 }
 0x2b3   : > { %v1472_v3 = vadd.f32 %v1420_v62, %v1130_v61  ;;  %v947_v4 = vpop.f32.mrf.mxu3  ;;  %v1883_v33 = vpop.f32.mrf.mxu0  ;;  %v2791_v61 = vshll.u32 %v3686_v48, 16  ;;  %v1674_v62 = vor.u32 %v1673_v50, %v1670_v41 }
 0x2b4   : > { %v1070_v33 = vor.u32 %v1069_v57, %v1066_v54  ;;  %v1205_v54 = vld [vmem:[#allocation2 + $0x64] sm:$0x1]  ;;  %v1073_v57 = vshrl.u32 %v963_v27, 16 }
 0x2b5   : > { %v2793_v15 = vrot.slane %v2791_v61, 1 }
 0x2b6   : > { %v1134_v10 = vpop.f32.mrf.mxu1 }
 0x2b7   : > { %v4690_v10 = vld [vmem:[#allocation2 + $0x5c] sm:$0xff]  ;;  %v2794_v20 = vor.u32 %v2793_v15, %v2789_v46  ;;  %v1075_v15 = vrot.slane %v1073_v57, 3 }
 0x2b8   : > { %3454 = vmatmul.msk.bf16.gmra.mxu3 %vm847_vm9, %v1666_v14  ;;  %v1356_v14 = vshrl.u32 %v3672_v0, 16 }
 0x2b9   : > { %3381 = vmatmul.msk.bf16.gmra.mxu1 %vm847_vm9, %v4666_v2 }
 0x2ba   : > { %v1422_v24 = vpop.f32.mrf.mxu2  ;;  %v1358_v23 = vor.u32 %v1356_v14, %v1354_v30 }
 0x2bb   : > { %v1473_v32 = vadd.f32 %v1422_v24, %v1132_v22  ;;  %v1742_v34 = vpop.f32.mrf.mxu3  ;;  %v4674_v42 = vpop.f32.mrf.mxu0  ;;  %v1675_v22 = vsel %vm964_vm0, %v1665_v6, %v1674_v62  ;;  %v4131_v24 = vld [vmem:[#allocation2 + $0x64] sm:$0xff]   ;;  %v2798_v6 = vrot.slane %v2796_v5, 1 }
 0x2bc   : > { %v4672_v49 = vadd.f32 %v1742_v34, %v1472_v3  ;;  %v1360_v34 = vshll.u32 %v4690_v10, 16  ;;  %v1677_v50 = vshrl.u32 %v4131_v24, 16  ;;  %v1680_v55 = vshll.u32 %v4131_v24, 16 }
 0x2be   : > { %v1135_v40 = vpop.f32.mrf.mxu1  ;;  %3470 = vmatmul.msk.bf16.gmra.mxu0 %vm847_vm9, %v4679_v39  ;;  %v1679_v30 = vrot.slane %v1677_v50, 3  ;;  %v1682_v14 = vrot.slane %v1680_v55, 4  ;;  %v1364_v55 = vshrl.u32 %v4690_v10, 16 }
 0x2bf   : > { %3442 = vmatmul.msk.bf16.gmra.mxu2 %vm847_vm9, %v1355_v51  ;;  %v1136_v17 = vadd.f32 %v1135_v40, %v4571_v43  ;;  %v2799_v43 = vsel %vm1271_vm8, %v2794_v20, %v2798_v6  ;;  %v1257_v40 = vunpack.c.l.b16 %v1205_v54 }
 0x2c2   : > { %v1425_v58 = vpop.f32.mrf.mxu2 }
 0x2c3   : > { %v1744_v47 = vpop.f32.mrf.mxu3  ;;  %v4688_v4 = vpop.f32.mrf.mxu0  ;;  %v1076_v58 = vshll.u32 %v963_v27, 16  ;;  %v1270_v27 = vpack.c.b16 %v1257_v40, %v1257_v40 }
 0x2c4   : > { %v4686_v3 = vadd.f32 %v1744_v47, %v1473_v32  ;;  %v1071_v32 = vsel %vm964_vm0, %v4661_v7, %v1070_v33  ;;  %v1362_v47 = vrot.slane %v1360_v34, 1  ;;  %v3789_v34 = vunpack.c.h.b16 %v4679_v39 }
 0x2c5   : > { %v1078_v5 = vrot.slane %v1076_v58, 4  ;;  %v1368_v57 = vshll.u32 %v1270_v27, 16 }
 0x2c6   : > { %v1138_v12 = vpop.f32.mrf.mxu1  ;;  %v1363_v48 = vsel %vm1271_vm8, %v1358_v23, %v1362_v47  ;;  %v4708_v23 = vld [vmem:[#allocation2 + $0x2c] sm:$0xff]  ;;  %v1366_v10 = vor.u32 %v1364_v55, %v1362_v47  ;;  %v3675_v47 = vld [vmem:[#allocation2 + $0x18] sm:$0xff] }
 0x2c7   : > { %v1139_v24 = vadd.f32 %v1138_v12, %v4582_v59  ;;  %v1079_v54 = vor.u32 %v1078_v5, %v1075_v15  ;;  %v2800_v59 = vshrl.u32 %v4684_v60, 16  ;;  %v1577_v12 = vpack.c.b16 %v3789_v34, %v3789_v34 }
 0x2c8   : > { %3455 = vmatmul.msk.bf16.gmra.mxu3 %vm847_vm9, %v1675_v22  ;;  %v2804_v39 = vshll.u32 %v4708_v23, 16  ;;  %v1370_v40 = vrot.slane %v1368_v57, 1 }
 0x2c9   : > { %3382 = vmatmul.msk.bf16.gmra.mxu1 %vm847_vm9, %v1071_v32  ;;  %v1686_v60 = vshrl.u32 %v1577_v12, 16 }
 0x2ca   : > { %v1426_v0 = vpop.f32.mrf.mxu2 }
 0x2cb   : > { %v1474_v51 = vadd.f32 %v1426_v0, %v1136_v17  ;;  %v1747_v41 = vpop.f32.mrf.mxu3  ;;  %v1890_v61 = vpop.f32.mrf.mxu0  ;;  %v1683_v0 = vor.u32 %v1682_v14, %v1679_v30  ;;  %v2802_v30 = vor.u32 %v2800_v59, %v2798_v6  ;;  %v1689_v14 = vshll.u32 %v1577_v12, 16 }
 0x2cc   : > { %v1080_v61 = vsel %vm964_vm0, %v1070_v33, %v1079_v54  ;;  %v1688_v55 = vrot.slane %v1686_v60, 3  ;;  %v3689_v60 = vld [vmem:[#allocation2 + $0x34] sm:$0xff] }
 0x2cd   : > { %v1684_v58 = vsel %vm964_vm0, %v1674_v62, %v1683_v0  ;;  %v2806_v62 = vrot.slane %v2804_v39, 1  ;;  %v1691_v6 = vrot.slane %v1689_v14, 4  ;;  %v2038_v39 = vshll.u32 %v3675_v47, 16 }
 0x2ce   : > { %v1140_v22 = vpop.f32.mrf.mxu1  ;;  %3607 = vmatmul.msk.bf16.vlgmr.msra.gmra.mxu0 %vm847_vm9, %v2799_v43 }
 0x2cf   : > { %3443 = vmatmul.msk.bf16.gmra.mxu2 %vm847_vm9, %v1363_v48  ;;  %v2246_v22 = vld [vmem:[#allocation2 + $0x18] sm:$0x8]  ;;  %v4721_v48 = vld [vmem:[#allocation2 + $0x1c] sm:$0xf]  ;;  %v2807_v54 = vsel %vm1271_vm8, %v2802_v30, %v2806_v62 }
 0x2d0   : > { %v2299_v27 = vunpack.c.l.b16 %v4721_v48  ;;  %v1692_v48 = vor.u32 %v1691_v6, %v1688_v55 }
 0x2d2   : > { %v1429_v32 = vpop.f32.mrf.mxu2 }
 0x2d3   : > { %v1475_v46 = vadd.f32 %v1429_v32, %v1139_v24  ;;  %v1748_v17 = vpop.f32.mrf.mxu3  ;;  %v4712_v41 = vpop.f32.mrf.mxu0  ;;  %v2298_v32 = vunpack.c.l.b16 %v2246_v22 }
 0x2d4   : > { %v4710_v20 = vadd.f32 %v1748_v17, %v1474_v51  ;;  %v3674_v51 = vld [vmem:[#allocation2 + $0x10] sm:$0xff]  ;;  %v1371_v17 = vsel %vm1271_vm8, %v1366_v10, %v1370_v40 }
 0x2d5   : > { %v2033_v33 = vshll.u32 %v3674_v51, 16  ;;  %v2323_v59 = vpack.c.b16 %v2299_v27, %v2298_v32  ;;  %v2812_v32 = vshll.u32 %v3689_v60, 16 }
 0x2d6   : > { %v1142_v50 = vpop.f32.mrf.mxu1 }
 0x2d7   : > { %v2035_v57 = vrot.slane %v2033_v33, 1  ;;  %v1143_v12 = vadd.f32 %v1142_v50, %v4573_v45  ;;  %v2337_v40 = vshrl.u32 %v2323_v59, 16  ;;  %v2340_v30 = vshll.u32 %v2323_v59, 16 }
 0x2d8   : > { %3456 = vmatmul.msk.bf16.gmra.mxu3 %vm847_vm9, %v1684_v58 }
 0x2d9   : > { %3383 = vmatmul.msk.bf16.gmra.mxu1 %vm847_vm9, %v1080_v61  ;;  %v2339_v50 = vrot.slane %v2337_v40, 3  ;;  %v2342_v33 = vrot.slane %v2340_v30, 4  ;;  %v2042_v30 = vshrl.u32 %v3675_v47, 16 }
 0x2da   : > { %v1431_v43 = vpop.f32.mrf.mxu2 }
 0x2db   : > { %v1751_v15 = vpop.f32.mrf.mxu3  ;;  %v4725_v24 = vpop.f32.mrf.mxu0 }
 0x2dc   : > { %v4723_v5 = vadd.f32 %v1751_v15, %v1475_v46  ;;  %v2031_v46 = vshrl.u32 %v3674_v51, 16  ;;  %v2040_v15 = vrot.slane %v2038_v39, 1  ;;  %v1693_v51 = vsel %vm964_vm0, %v1683_v0, %v1692_v48 }
 0x2dd   : > { %v2343_v0 = vor.u32 %v2342_v33, %v2339_v50  ;;  %v2816_v33 = vshrl.u32 %v3689_v60, 16 }
 0x2de   : > { %v1144_v34 = vpop.f32.mrf.mxu1  ;;  %3608 = vmatmul.msk.bf16.gmra.mxu0 %vm847_vm9, %v2807_v54  ;;  %v2036_v10 = vor.u32 %v2035_v57, %v2031_v46 }
 0x2df   : > { %3444 = vmatmul.msk.bf16.gmra.mxu2 %vm847_vm9, %v1371_v17  ;;  %v2808_v17 = vshrl.u32 %v4708_v23, 16  ;;  %v1145_v54 = vadd.f32 %v1144_v34, %v4584_v63  ;;  %v3792_v34 = vunpack.c.l.b16 %v4518_v11 }
 0x2e0   : > { %v2041_v45 = vsel %vm1271_vm8, %v2036_v10, %v2040_v15 }
 0x2e1   : > { %v2810_v6 = vor.u32 %v2808_v17, %v2806_v62 }
 0x2e2   : > { %v1433_v58 = vpop.f32.mrf.mxu2 }
 0x2e3   : > { %v1476_v61 = vadd.f32 %v1433_v58, %v1143_v12  ;;  %v1753_v22 = vpop.f32.mrf.mxu3  ;;  %v1896_v43 = vpop.f32.mrf.mxu0  ;;  %v2814_v12 = vrot.slane %v2812_v32, 1  ;;  %v3676_v58 = vld [vmem:[#allocation2 + $0x20] sm:$0xff] }
 0x2e4   : > { %v2352_v22 = vsel %vm964_vm0, %v2343_v0, %v4543_v1  ;;  %v2046_v63 = vshll.u32 %v3676_v58, 16  ;;  %v2044_v1 = vor.u32 %v2042_v30, %v2040_v15 }
 0x2e5   : > { %v2815_v48 = vsel %vm1271_vm8, %v2810_v6, %v2814_v12 }
 0x2e6   : > { %v1147_v14 = vpop.f32.mrf.mxu1 }
 0x2e7   : > { %v2048_v14 = vrot.slane %v2046_v63, 1  ;;  %v2050_v63 = vshrl.u32 %v3676_v58, 16 }
 0x2e8   : > { %3457 = vmatmul.msk.bf16.gmra.mxu3 %vm847_vm9, %v1693_v51  ;;  %v2570_v51 = vpack.c.b16 %v3792_v34, %v2299_v27  ;;  %v3691_v34 = vld [vmem:[#allocation2 + $0x44] sm:$0xff] }
 0x2e9   : > { %3520 = vmatmul.msk.bf16.vlgmr.msra.gmra.mxu1 %vm847_vm9, %v2041_v45  ;;  %v2049_v50 = vsel %vm1271_vm8, %v2044_v1, %v2048_v14  ;;  %v2052_v30 = vor.u32 %v2050_v63, %v2048_v14  ;;  %v4068_v1 = vld [vmem:[#allocation2 + $0x24] sm:$0xff]   ;;  %v2832_v63 = vshrl.u32 %v3691_v34, 16 }
 0x2ea   : > { %v1435_v55 = vpop.f32.mrf.mxu2 }
 0x2eb   : > { %v1477_v46 = vadd.f32 %v1435_v55, %v1145_v54  ;;  %v1755_v57 = vpop.f32.mrf.mxu3  ;;  %v4741_v23 = vpop.f32.mrf.mxu0  ;;  %v2818_v54 = vor.u32 %v2816_v33, %v2814_v12 }
 0x2ec   : > { %v4739_v59 = vadd.f32 %v1755_v57, %v1476_v61  ;;  %v3690_v61 = vld [vmem:[#allocation2 + $0x3c] sm:$0xff]  ;;  %v3677_v57 = vld [vmem:[#allocation2 + $0x28] sm:$0xff] }
 0x2ed   : > { %v2820_v45 = vshll.u32 %v3690_v61, 16  ;;  %v2054_v60 = vshll.u32 %v3677_v57, 16 }
 0x2ee   : > { %v1148_v39 = vpop.f32.mrf.mxu1  ;;  %3609 = vmatmul.msk.bf16.gmra.mxu0 %vm847_vm9, %v2815_v48 }
 0x2ef   : > { %3533 = vmatmul.msk.bf16.vlgmr.msra.gmra.mxu2 %vm847_vm9, %v2352_v22  ;;  %v1149_v32 = vadd.f32 %v1148_v39, %v4609_v31  ;;  %v2822_v55 = vrot.slane %v2820_v45, 1  ;;  %v2828_v45 = vshll.u32 %v3691_v34, 16 }
 0x2f1   : > { %v2823_v27 = vsel %vm1271_vm8, %v2818_v54, %v2822_v55  ;;  %v2830_v58 = vrot.slane %v2828_v45, 1  ;;  %v3678_v54 = vld [vmem:[#allocation2 + $0x30] sm:$0xff] }
 0x2f2   : > { %v1438_v62 = vpop.f32.mrf.mxu2 }
 0x2f3   : > { %v1757_v43 = vpop.f32.mrf.mxu3  ;;  %v4751_v40 = vpop.f32.mrf.mxu0  ;;  %v2056_v62 = vrot.slane %v2054_v60, 1 }
 0x2f4   : > { %v4749_v10 = vadd.f32 %v1757_v43, %v1477_v46 }
 0x2f6   : > { %v1151_v17 = vpop.f32.mrf.mxu1 }
 0x2f7   : > { %v1152_v31 = vadd.f32 %v1151_v17, %v4621_v44 }
 0x2f8   : > { %3546 = vmatmul.msk.bf16.vlgmr.msra.gmra.mxu3 %vm847_vm9, %v2570_v51  ;;  %v2824_v51 = vshrl.u32 %v3690_v61, 16  ;;  %v2058_v61 = vshrl.u32 %v3677_v57, 16 }
 0x2f9   : > { %3521 = vmatmul.msk.bf16.gmra.mxu1 %vm847_vm9, %v2049_v50 }
 0x2fa   : > { %v1439_v11 = vpop.f32.mrf.mxu2  ;;  %v2826_v17 = vor.u32 %v2824_v51, %v2822_v55  ;;  %v2062_v55 = vshll.u32 %v3678_v54, 16  ;;  %v2060_v60 = vor.u32 %v2058_v61, %v2056_v62 }
 0x2fb   : > { %v1478_v6 = vadd.f32 %v1439_v11, %v1149_v32  ;;  %v1760_v46 = vpop.f32.mrf.mxu3  ;;  %v1903_v47 = vpop.f32.mrf.mxu0 }
 0x2fc   : > { %v2831_v14 = vsel %vm1271_vm8, %v2826_v17, %v2830_v58 }
 0x2fe   : > { %v1153_v0 = vpop.f32.mrf.mxu1  ;;  %3610 = vmatmul.msk.bf16.gmra.mxu0 %vm847_vm9, %v2823_v27 }
 0x2ff   : > { %3534 = vmatmul.msk.bf16.gmra.mxu2 %vm847_vm9, %v4560_v28  ;;  %v2057_v28 = vsel %vm1271_vm8, %v2052_v30, %v2056_v62 }
 0x302   : > { %v1442_v15 = vpop.f32.mrf.mxu2 }
 0x303   : > { %v1479_v39 = vadd.f32 %v1442_v15, %v1152_v31  ;;  %v1761_v22 = vpop.f32.mrf.mxu3  ;;  %v4764_v48 = vpop.f32.mrf.mxu0  ;;  %v3692_v31 = vld [vmem:[#allocation2 + $0x4c] sm:$0xff] }
 0x304   : > { %v4762_v12 = vadd.f32 %v1761_v22, %v1478_v6  ;;  %v4070_v22 = vld [vmem:[#allocation2 + $0x2c] sm:$0xff]  }
 0x306   : > { %v1155_v43 = vpop.f32.mrf.mxu1 }
 0x307   : > { %v1156_v6 = vadd.f32 %v1155_v43, %v4592_v9  ;;  %v2834_v43 = vor.u32 %v2832_v63, %v2830_v58  ;;  %v3693_v58 = vld [vmem:[#allocation2 + $0x54] sm:$0xff] }
 0x308   : > { %3547 = vmatmul.msk.bf16.gmra.mxu3 %vm847_vm9, %v4068_v1 }
 0x309   : > { %3522 = vmatmul.msk.bf16.gmra.mxu1 %vm847_vm9, %v2057_v28 }
 0x30a   : > { %v1444_v44 = vpop.f32.mrf.mxu2 }
 0x30b   : > { %v1764_v50 = vpop.f32.mrf.mxu3  ;;  %v4771_v32 = vpop.f32.mrf.mxu0  ;;  %v3679_v44 = vld [vmem:[#allocation2 + $0x38] sm:$0xff] }
 0x30c   : > { %v4769_v33 = vadd.f32 %v1764_v50, %v1479_v39  ;;  %v2064_v39 = vrot.slane %v2062_v55, 1 }
 0x30e   : > { %v1157_v11 = vpop.f32.mrf.mxu1  ;;  %3611 = vmatmul.msk.bf16.gmra.mxu0 %vm847_vm9, %v2831_v14  ;;  %v2065_v30 = vsel %vm1271_vm8, %v2060_v60, %v2064_v39 }
 0x30f   : > { %3535 = vmatmul.msk.bf16.gmra.mxu2 %vm847_vm9, %v4577_v53  ;;  %v2836_v53 = vshll.u32 %v3692_v31, 16  ;;  %v1158_v57 = vadd.f32 %v1157_v11, %v4601_v21  ;;  %v2070_v21 = vshll.u32 %v3679_v44, 16  ;;  %v2066_v11 = vshrl.u32 %v3678_v54, 16 }
 0x311   : > { %v2838_v45 = vrot.slane %v2836_v53, 1 }
 0x312   : > { %v1446_v46 = vpop.f32.mrf.mxu2 }
 0x313   : > { %v1480_v47 = vadd.f32 %v1446_v46, %v1156_v6  ;;  %v1766_v0 = vpop.f32.mrf.mxu3  ;;  %v1909_v27 = vpop.f32.mrf.mxu0  ;;  %v2839_v17 = vsel %vm1271_vm8, %v2834_v43, %v2838_v45  ;;  %v2072_v46 = vrot.slane %v2070_v21, 1  ;;  %v2074_v21 = vshrl.u32 %v3679_v44, 16 }
 0x314   : > { %v4072_v0 = vld [vmem:[#allocation2 + $0x34] sm:$0xff]   ;;  %v2844_v27 = vshll.u32 %v3693_v58, 16 }
 0x316   : > { %v1160_v15 = vpop.f32.mrf.mxu1  ;;  %v2846_v63 = vrot.slane %v2844_v27, 1  ;;  %v2848_v27 = vshrl.u32 %v3693_v58, 16 }
 0x318   : > { %3548 = vmatmul.msk.bf16.gmra.mxu3 %vm847_vm9, %v4070_v22 }
 0x319   : > { %3523 = vmatmul.msk.bf16.gmra.mxu1 %vm847_vm9, %v2065_v30 }
 0x31a   : > { %v1448_v9 = vpop.f32.mrf.mxu2 }
 0x31b   : > { %v1481_v1 = vadd.f32 %v1448_v9, %v1158_v57  ;;  %v1768_v51 = vpop.f32.mrf.mxu3  ;;  %v4784_v62 = vpop.f32.mrf.mxu0  ;;  %v3680_v9 = vld [vmem:[#allocation2 + $0x40] sm:$0xff] }
 0x31c   : > { %v4782_v28 = vadd.f32 %v1768_v51, %v1480_v47  ;;  %v2068_v47 = vor.u32 %v2066_v11, %v2064_v39  ;;  %v3694_v11 = vld [vmem:[#allocation2 + $0x5c] sm:$0xff]  ;;  %v2082_v58 = vshrl.u32 %v3680_v9, 16 }
 0x31e   : > { %v1161_v34 = vpop.f32.mrf.mxu1  ;;  %3612 = vmatmul.msk.bf16.gmra.mxu0 %vm847_vm9, %v2839_v17  ;;  %v2073_v60 = vsel %vm1271_vm8, %v2068_v47, %v2072_v46  ;;  %v2076_v47 = vor.u32 %v2074_v21, %v2072_v46  ;;  %v4076_v21 = vld [vmem:[#allocation2 + $0x44] sm:$0xff]  }
 0x31f   : > { %3536 = vmatmul.msk.bf16.gmra.mxu2 %vm847_vm9, %v4596_v18  ;;  %v2840_v18 = vshrl.u32 %v3692_v31, 16  ;;  %v1162_v15 = vadd.f32 %v1161_v34, %v4630_v56  ;;  %v2078_v31 = vshll.u32 %v3680_v9, 16 }
 0x321   : > { %v2842_v22 = vor.u32 %v2840_v18, %v2838_v45 }
 0x322   : > { %v1451_v50 = vpop.f32.mrf.mxu2 }
 0x323   : > { %v1770_v14 = vpop.f32.mrf.mxu3  ;;  %v4792_v6 = vpop.f32.mrf.mxu0  ;;  %v2847_v39 = vsel %vm1271_vm8, %v2842_v22, %v2846_v63  ;;  %v2080_v50 = vrot.slane %v2078_v31, 1 }
 0x324   : > { %v4790_v61 = vadd.f32 %v1770_v14, %v1481_v1 }
 0x326   : > { %v1164_v55 = vpop.f32.mrf.mxu1 }
 0x327   : > { %v1165_v56 = vadd.f32 %v1164_v55, %v4638_v13  ;;  %v2850_v55 = vor.u32 %v2848_v27, %v2846_v63 }
 0x328   : > { %3549 = vmatmul.msk.bf16.gmra.mxu3 %vm847_vm9, %v4072_v0  ;;  %v4074_v0 = vld [vmem:[#allocation2 + $0x3c] sm:$0xff]  }
 0x329   : > { %3524 = vmatmul.msk.bf16.gmra.mxu1 %vm847_vm9, %v2073_v60  ;;  %v2852_v60 = vshll.u32 %v3694_v11, 16 }
 0x32a   : > { %v1452_v54 = vpop.f32.mrf.mxu2 }
 0x32b   : > { %v1482_v30 = vadd.f32 %v1452_v54, %v1162_v15  ;;  %v1773_v53 = vpop.f32.mrf.mxu3  ;;  %v1916_v57 = vpop.f32.mrf.mxu0  ;;  %v2854_v44 = vrot.slane %v2852_v60, 1 }
 0x32d   : > { %v2855_v46 = vsel %vm1271_vm8, %v2850_v55, %v2854_v44  ;;  %v3682_v55 = vld [vmem:[#allocation2 + $0x50] sm:$0xff] }
 0x32e   : > { %v1166_v43 = vpop.f32.mrf.mxu1  ;;  %3613 = vmatmul.msk.bf16.gmra.mxu0 %vm847_vm9, %v2847_v39 }
 0x32f   : > { %3537 = vmatmul.msk.bf16.gmra.mxu2 %vm847_vm9, %v4625_v52  ;;  %v2081_v52 = vsel %vm1271_vm8, %v2076_v47, %v2080_v50  ;;  %v3695_v43 = vld [vmem:[#allocation2 + $0x64] sm:$0xff]  ;;  %v2856_v47 = vshrl.u32 %v3694_v11, 16 }
 0x331   : > { %v2858_v9 = vor.u32 %v2856_v47, %v2854_v44 }
 0x332   : > { %v1455_v1 = vpop.f32.mrf.mxu2 }
 0x333   : > { %v1483_v51 = vadd.f32 %v1455_v1, %v1165_v56  ;;  %v1774_v34 = vpop.f32.mrf.mxu3  ;;  %v4805_v17 = vpop.f32.mrf.mxu0  ;;  %v2084_v1 = vor.u32 %v2082_v58, %v2080_v50 }
 0x334   : > { %v4803_v45 = vadd.f32 %v1774_v34, %v1482_v30  ;;  %v3681_v30 = vld [vmem:[#allocation2 + $0x48] sm:$0xff] }
 0x335   : > { %v2086_v63 = vshll.u32 %v3681_v30, 16 }
 0x336   : > { %v1168_v14 = vpop.f32.mrf.mxu1 }
 0x337   : > { %v1169_v53 = vadd.f32 %v1168_v14, %v4603_v25  ;;  %v2088_v34 = vrot.slane %v2086_v63, 1  ;;  %v2090_v63 = vshrl.u32 %v3681_v30, 16 }
 0x338   : > { %3550 = vmatmul.msk.bf16.gmra.mxu3 %vm847_vm9, %v4074_v0  ;;  %v2860_v0 = vshll.u32 %v3695_v43, 16 }
 0x339   : > { %3525 = vmatmul.msk.bf16.gmra.mxu1 %vm847_vm9, %v2081_v52  ;;  %v2089_v27 = vsel %vm1271_vm8, %v2084_v1, %v2088_v34  ;;  %v2092_v1 = vor.u32 %v2090_v63, %v2088_v34 }
 0x33a   : > { %v1457_v13 = vpop.f32.mrf.mxu2  ;;  %v2862_v14 = vrot.slane %v2860_v0, 1  ;;  %v2864_v0 = vshrl.u32 %v3695_v43, 16 }
 0x33b   : > { %v1777_v18 = vpop.f32.mrf.mxu3  ;;  %v4812_v54 = vpop.f32.mrf.mxu0 }
 0x33c   : > { %v4810_v15 = vadd.f32 %v1777_v18, %v1483_v51  ;;  %5049 = vst [vmem:[#allocation3_spill] sm:$0xff] %v4812_v54  ;;  %v2863_v18 = vsel %vm1271_vm8, %v2858_v9, %v2862_v14 }
 0x33e   : > { %v1170_v22 = vpop.f32.mrf.mxu1  ;;  %3614 = vmatmul.msk.bf16.gmra.mxu0 %vm847_vm9, %v2855_v46 }
 0x33f   : > { %3538 = vmatmul.msk.bf16.gmra.mxu2 %vm847_vm9, %v4646_v29  ;;  %v1171_v29 = vadd.f32 %v1170_v22, %v4617_v38  ;;  %v3896_v38 = vld [vmem:[#allocation2 + $0x58] sm:$0xff]   ;;  %v2094_v22 = vshll.u32 %v3682_v55, 16 }
 0x340   : > { %v2408_v44 = vshrl.u32 %v3896_v38, 16  ;;  %v2411_v58 = vshll.u32 %v3896_v38, 16 }
 0x342   : > { %v1459_v57 = vpop.f32.mrf.mxu2  ;;  %v2413_v47 = vrot.slane %v2411_v58, 4 }
 0x343   : > { %v1484_v39 = vadd.f32 %v1459_v57, %v1169_v53  ;;  %v1779_v31 = vpop.f32.mrf.mxu3  ;;  %v1922_v56 = vpop.f32.mrf.mxu0  ;;  %v4831_v53 = vld [vmem:[#allocation2 + $0x6c] sm:$0xff] }
 0x344   : > { %v2096_v56 = vrot.slane %v2094_v22, 1  ;;  %v3683_v22 = vld [vmem:[#allocation2 + $0x58] sm:$0xff] }
 0x346   : > { %v1173_v51 = vpop.f32.mrf.mxu1 }
 0x348   : > { %3551 = vmatmul.msk.bf16.gmra.mxu3 %vm847_vm9, %v4076_v21  ;;  %v4078_v21 = vld [vmem:[#allocation2 + $0x4c] sm:$0xff]  }
 0x349   : > { %3526 = vmatmul.msk.bf16.gmra.mxu1 %vm847_vm9, %v2089_v27  ;;  %v2868_v27 = vshll.u32 %v4831_v53, 16 }
 0x34a   : > { %v1461_v25 = vpop.f32.mrf.mxu2 }
 0x34b   : > { %v1485_v52 = vadd.f32 %v1461_v25, %v1171_v29  ;;  %v1781_v60 = vpop.f32.mrf.mxu3  ;;  %v4825_v50 = vpop.f32.mrf.mxu0  ;;  %v2097_v29 = vsel %vm1271_vm8, %v2092_v1, %v2096_v56 }
 0x34c   : > { %v4823_v13 = vadd.f32 %v1781_v60, %v1484_v39  ;;  %v4842_v60 = vrot.slane %v2868_v27, 1 }
 0x34e   : > { %v1174_v11 = vpop.f32.mrf.mxu1  ;;  %3615 = vmatmul.msk.bf16.gmra.mxu0 %vm847_vm9, %v2863_v18 }
 0x34f   : > { %3539 = vmatmul.msk.bf16.gmra.mxu2 %vm847_vm9, %v4666_v2  ;;  %v2410_v2 = vrot.slane %v2408_v44, 3  ;;  %v1175_v25 = vadd.f32 %v1174_v11, %v4640_v16  ;;  %v3897_v16 = vld [vmem:[#allocation2 + $0x60] sm:$0xff]   ;;  %v2102_v11 = vshll.u32 %v3683_v22, 16 }
 0x350   : > { %v2420_v63 = vshll.u32 %v3897_v16, 16 }
 0x351   : > { %v2414_v9 = vor.u32 %v2413_v47, %v2410_v2 }
 0x352   : > { %v1464_v46 = vpop.f32.mrf.mxu2 }
 0x353   : > { %v1783_v57 = vpop.f32.mrf.mxu3  ;;  %v4835_v31 = vpop.f32.mrf.mxu0  ;;  %v2415_v46 = vsel %vm964_vm0, %v4661_v7, %v2414_v9  ;;  %v2098_v7 = vshrl.u32 %v3682_v55, 16  ;;  %v3684_v55 = vld [vmem:[#allocation2 + $0x60] sm:$0xff] }
 0x354   : > { %v4833_v39 = vadd.f32 %v1783_v57, %v1485_v52  ;;  %v2866_v52 = vor.u32 %v2864_v0, %v2862_v14  ;;  %v2417_v57 = vshrl.u32 %v3897_v16, 16  ;;  %v2104_v0 = vrot.slane %v2102_v11, 1 }
 0x355   : > { %v2106_v16 = vshrl.u32 %v3683_v22, 16  ;;  %v2110_v11 = vshll.u32 %v3684_v55, 16 }
 0x356   : > { %v1177_v51 = vpop.f32.mrf.mxu1  ;;  %v2871_v44 = vsel %vm1271_vm8, %v2866_v52, %v4842_v60  ;;  %v2422_v52 = vrot.slane %v2420_v63, 4 }
 0x357   : > { %v1178_v14 = vadd.f32 %v1177_v51, %v4651_v35 }
 0x358   : > { %3552 = vmatmul.msk.bf16.gmra.mxu3 %vm847_vm9, %v4078_v21 }
 0x359   : > { %3527 = vmatmul.msk.bf16.gmra.mxu1 %vm847_vm9, %v2097_v29  ;;  %v2100_v29 = vor.u32 %v2098_v7, %v2096_v56  ;;  %v2108_v7 = vor.u32 %v2106_v16, %v2104_v0  ;;  %v4876_v16 = vld [vmem:[#allocation2 + $0x68] sm:$0xff] }
 0x35a   : > { %v1465_v30 = vpop.f32.mrf.mxu2 }
 0x35b   : > { %v1486_v34 = vadd.f32 %v1465_v30, %v1175_v25  ;;  %v1786_v18 = vpop.f32.mrf.mxu3  ;;  %v2941_v38 = vpop.f32.mrf.mxu0  ;;  %v4080_v25 = vld [vmem:[#allocation2 + $0x54] sm:$0xff]   ;;  %v2419_v30 = vrot.slane %v2417_v57, 3 }
 0x35c   : > { %v2105_v18 = vsel %vm1271_vm8, %v2100_v29, %v2104_v0  ;;  %v2112_v29 = vrot.slane %v2110_v11, 1 }
 0x35d   : > { %v2423_v51 = vor.u32 %v2422_v52, %v2419_v30  ;;  %v4082_v30 = vld [vmem:[#allocation2 + $0x5c] sm:$0xff]  }
 0x35e   : > { %v1179_v43 = vpop.f32.mrf.mxu1  ;;  %3616 = vmatmul.msk.bf16.gmra.mxu0 %vm847_vm9, %v2871_v44  ;;  %v3898_v44 = vld [vmem:[#allocation2 + $0x68] sm:$0xff]  }
 0x35f   : > { %3540 = vmatmul.msk.bf16.gmra.mxu2 %vm847_vm9, %v2415_v46  ;;  %v2424_v56 = vsel %vm964_vm0, %v2414_v9, %v2423_v51  ;;  %v2429_v57 = vshll.u32 %v3898_v44, 16 }
 0x361   : > { %v2431_v9 = vrot.slane %v2429_v57, 4 }
 0x362   : > { %v1468_v58 = vpop.f32.mrf.mxu2 }
 0x363   : > { %v1487_v1 = vadd.f32 %v1468_v58, %v1178_v14  ;;  %v1787_v21 = vpop.f32.mrf.mxu3  ;;  %v4853_v47 = vpop.f32.mrf.mxu0  ;;  %v2426_v58 = vshrl.u32 %v3898_v44, 16 }
 0x364   : > { %v4851_v2 = vadd.f32 %v1787_v21, %v1486_v34 }
 0x365   : > { %v2428_v52 = vrot.slane %v2426_v58, 3  ;;  %v3835_v58 = vld [vmem:[%s4337_s14] sm:$0xff]  }
 0x366   : > { %v2178_v27 = vpop.f32.mrf.mxu1 }
 0x368   : > { %3553 = vmatmul.msk.bf16.gmra.mxu3 %vm847_vm9, %v4080_v25 }
 0x369   : > { %3528 = vmatmul.msk.bf16.gmra.mxu1 %vm847_vm9, %v2105_v18 }
 0x36a   : > { %v1470_v35 = vpop.f32.mrf.mxu2 }
 0x36b   : > { %v1790_v38 = vpop.f32.mrf.mxu3  ;;  %v4860_v43 = vpop.f32.mrf.mxu0  ;;  %v2113_v35 = vsel %vm1271_vm8, %v2108_v7, %v2112_v29 }
 0x36c   : > { %v4858_v34 = vadd.f32 %v1790_v38, %v1487_v1  ;;  %v1924_v1 = vadd.f32 %v4605_v26, %v4672_v49  ;;  %v4872_v26 = vperm.slane %v4331_v8, 0  ;;  %v3697_v8 = vld [vmem:[#allocation2 + $0x74] sm:$0xff] }
 0x36e   : > { %v2180_v46 = vpop.f32.mrf.mxu1  ;;  %v2230_v18 = vadd.f32 %v2178_v27, %v1924_v1  ;;  %v1925_v27 = vadd.f32 %v4619_v36, %v4686_v3  ;;  %v2118_v36 = vshll.u32 %v4876_v16, 16  ;;  %v3836_v3 = vunpack.c.l.bf16 %v3835_v58 }
 0x36f   : > { %3541 = vmatmul.msk.bf16.gmra.mxu2 %vm847_vm9, %v2424_v56  ;;  %v4869_v56 = vor.u32 %v2431_v9, %v2428_v52  ;;  %v2876_v52 = vshll.u32 %v3697_v8, 16 }
 0x370   : > { %v2231_v7 = vadd.f32 %v2180_v46, %v1925_v27 }
 0x372   : > { %v2500_v14 = vpop.f32.mrf.mxu2 }
 0x373   : > { %v1792_v63 = vpop.f32.mrf.mxu3  ;;  %v2947_v21 = vpop.f32.mrf.mxu0  ;;  %v2552_v22 = vadd.f32 %v2500_v14, %v2230_v18  ;;  %v2433_v14 = vsel %vm964_vm0, %v2423_v51, %v4869_v56 }
 0x374   : > { %v4886_v63 = vld [vmem:[#allocation2 + $0x70] sm:$0xff]   ;;  %v2872_v21 = vshrl.u32 %v4831_v53, 16  ;;  %v2878_v53 = vrot.slane %v2876_v52, 1 }
 0x376   : > { %v2183_v25 = vpop.f32.mrf.mxu1 }
 0x377   : > { %v2114_v25 = vshrl.u32 %v3684_v55, 16 }
 0x378   : > { %3554 = vmatmul.msk.bf16.gmra.mxu3 %vm847_vm9, %v4082_v30  ;;  %v2874_v30 = vor.u32 %v2872_v21, %v4842_v60  ;;  %v2120_v21 = vrot.slane %v2118_v36, 1 }
 0x379   : > { %3529 = vmatmul.msk.bf16.gmra.mxu1 %vm847_vm9, %v2113_v35  ;;  %v2438_v35 = vshll.u32 %v4886_v63, 16 }
 0x37a   : > { %v2502_v38 = vpop.f32.mrf.mxu2 }
 0x37b   : > { %v2630_v0 = vpop.f32.mrf.mxu3  ;;  %v4874_v49 = vpop.f32.mrf.mxu0  ;;  %v2553_v51 = vadd.f32 %v2502_v38, %v2231_v7  ;;  %v4084_v7 = vld [vmem:[#allocation2 + $0x64] sm:$0xff]   ;;  %v2440_v54 = vrot.slane %v2438_v35, 4 }
 0x37c   : > { %v2682_v44 = vadd.f32 %v2630_v0, %v2552_v22 }
 0x37e   : > { %v2988_v11 = vadd.f32 %v4825_v50, %v2682_v44  ;;  %v4882_v57 = vpop.f32.mrf.mxu1  ;;  %v2435_v50 = vshrl.u32 %v4886_v63, 16  ;;  %v2116_v44 = vor.u32 %v2114_v25, %v2112_v29 }
 0x37f   : > { %3542 = vmatmul.msk.bf16.gmra.mxu2 %vm847_vm9, %v2433_v14  ;;  %v2879_v14 = vsel %vm1271_vm8, %v2874_v30, %v2878_v53  ;;  %v3837_v30 = vunpack.c.h.bf16 %v3835_v58  ;;  %v1926_v58 = vadd.f32 %v4642_v19, %v4710_v20 }
 0x380   : > { %v3007_v1 = vadd.f32 %v4872_v26, %v2988_v11  ;;  %v1964_v11 = vld [vmem:[#allocation2 + $0x70] sm:$0x1]  ;;  %3617 = vmatmul.msk.bf16.gmra.mxu0 %vm847_vm9, %v2879_v14  ;;  %v2121_v29 = vsel %vm1271_vm8, %v2116_v44, %v2120_v21 }
 0x381   : > { %v2016_v25 = vunpack.c.l.b16 %v1964_v11 }
 0x382   : > { %vm3023_vm14 = vcmp.ge.f32.partialorder %v3007_v1, 0.0  ;;  %v3039_v9 = vmul.f32 0.1, %v3007_v1  ;;  %v2505_v18 = vpop.f32.mrf.mxu2 }
 0x383   : > { %v2632_v22 = vpop.f32.mrf.mxu3  ;;  %v4895_v55 = vpop.f32.mrf.mxu0  ;;  %v2437_v18 = vrot.slane %v2435_v50, 3 }
 0x384   : > { %v3055_v46 = vsel %vm3023_vm14, %v3007_v1, %v3039_v9  ;;  %v2683_v0 = vadd.f32 %v2632_v22, %v2553_v51  ;;  %v2270_v1 = vld [vmem:[#allocation2 + $0x78] sm:$0xf] }
 0x385   : > { %v3075_v27 = vadd.f32 %v3836_v3, %v3055_v46  ;;  %v4905_v3 = vunpack.c.l.b16 %v2270_v1  ;;  %v2441_v9 = vor.u32 %v2440_v54, %v2437_v18  ;;  %v2880_v46 = vshrl.u32 %v3697_v8, 16 }
 0x386   : > { %v2989_v60 = vadd.f32 %v4835_v31, %v2683_v0  ;;  %v2187_v38 = vpop.f32.mrf.mxu1  ;;  %v2722_v31 = vld [vmem:[#allocation2 + $0x7c] sm:$0x1]  ;;  %v2122_v54 = vshrl.u32 %v4876_v16, 16 }
 0x387   : > { %3077 = vst.msk [vmem:[%s4342_s18] sm:$0xff] %vm486_vm7, %v3075_v27  ;;  %v2774_v36 = vunpack.c.l.b16 %v2722_v31  ;;  %v2029_v27 = vpack.c.b16 %v2016_v25, %v2016_v25  ;;  %v2335_v11 = vpack.c.b16 %v4905_v3, %v4905_v3  ;;  %v2442_v1 = vsel %vm964_vm0, %v4869_v56, %v2441_v9 }
 0x388   : > { %v3008_v52 = vadd.f32 %v4872_v26, %v2989_v60  ;;  %3555 = vmatmul.msk.bf16.gmra.mxu3 %vm847_vm9, %v4084_v7  ;;  %v2882_v8 = vor.u32 %v2880_v46, %v2878_v53 }
 0x389   : > { %3530 = vmatmul.msk.bf16.gmra.mxu1 %vm847_vm9, %v2121_v29  ;;  %v2787_v22 = vpack.c.b16 %v2774_v36, %v2774_v36  ;;  %v2126_v29 = vshll.u32 %v2029_v27, 16  ;;  %v2444_v25 = vshrl.u32 %v2335_v11, 16  ;;  %v2447_v31 = vshll.u32 %v2335_v11, 16 }
 0x38a   : > { %vm3024_vm15 = vcmp.ge.f32.partialorder %v3008_v52, 0.0  ;;  %v3040_v50 = vmul.f32 0.1, %v3008_v52  ;;  %v2506_v51 = vpop.f32.mrf.mxu2  ;;  %v2124_v36 = vor.u32 %v2122_v54, %v2120_v21 }
 0x38b   : > { %v2635_v35 = vpop.f32.mrf.mxu3  ;;  %v2954_v44 = vpop.f32.mrf.mxu0  ;;  %v2884_v60 = vshll.u32 %v2787_v22, 16  ;;  %v2128_v22 = vrot.slane %v2126_v29, 1  ;;  %v2446_v16 = vrot.slane %v2444_v25, 3  ;;  %v2449_v53 = vrot.slane %v2447_v31, 4 }
 0x38c   : > { %v3056_v0 = vsel %vm3024_vm15, %v3008_v52, %v3040_v50  ;;  %v2232_v52 = vadd.f32 %v4882_v57, %v1926_v58  ;;  %v1927_v57 = vadd.f32 %v4653_v37, %v4723_v5  ;;  %v3950_v44 = vld [vmem:[%s4337_s14 + $0x8] sm:$0xff]   ;;  %v3833_v25 = vunpack.c.h.b16 %v4886_v63 }
 0x38d   : > { %v3076_v14 = vadd.f32 %v3837_v30, %v3056_v0  ;;  %v2886_v18 = vrot.slane %v2884_v60, 1  ;;  %v4085_v0 = vld [vmem:[#allocation2 + $0x6c] sm:$0xff]   ;;  %v2129_v11 = vsel %vm1271_vm8, %v2124_v36, %v2128_v22  ;;  %v3840_v60 = vunpack.c.l.bf16 %v3950_v44 }
 0x38e   : > { %v2189_v7 = vpop.f32.mrf.mxu1  ;;  %v2554_v30 = vadd.f32 %v2506_v51, %v2232_v52  ;;  %v2233_v51 = vadd.f32 %v2187_v38, %v1927_v57  ;;  %v3841_v31 = vunpack.c.h.bf16 %v3950_v44  ;;  %v1929_v44 = vadd.f32 %v4688_v4, %v4749_v10 }
 0x38f   : > { %3078 = vst.msk [vmem:[%s4342_s18 + $0x8] sm:$0xff] %vm486_vm7, %v3076_v14  ;;  %3543 = vmatmul.msk.bf16.gmra.mxu2 %vm847_vm9, %v2442_v1  ;;  %v2887_v56 = vsel %vm1271_vm8, %v2882_v8, %v2886_v18  ;;  %v2450_v14 = vor.u32 %v2449_v53, %v2446_v16 }
 0x390   : > { %3618 = vmatmul.msk.bf16.gmra.mxu0 %vm847_vm9, %v2887_v56 }
 0x391   : > { %v2451_v38 = vsel %vm964_vm0, %v2441_v9, %v2450_v14 }
 0x392   : > { %v2509_v19 = vpop.f32.mrf.mxu2 }
 0x393   : > { %v2636_v20 = vpop.f32.mrf.mxu3  ;;  %v4920_v35 = vpop.f32.mrf.mxu0  ;;  %v2555_v58 = vadd.f32 %v2509_v19, %v2233_v51  ;;  %v3951_v51 = vld [vmem:[%s4337_s14 + $0x10] sm:$0xff]  }
 0x394   : > { %v2684_v50 = vadd.f32 %v2636_v20, %v2554_v30 }
 0x396   : > { %v2990_v46 = vadd.f32 %v4853_v47, %v2684_v50  ;;  %v2191_v27 = vpop.f32.mrf.mxu1  ;;  %v1928_v50 = vadd.f32 %v4674_v42, %v4739_v59 }
 0x398   : > { %v3009_v21 = vadd.f32 %v4872_v26, %v2990_v46  ;;  %3556 = vmatmul.msk.bf16.gmra.mxu3 %vm847_vm9, %v4085_v0  ;;  %v2234_v0 = vadd.f32 %v2191_v27, %v1928_v50  ;;  %v3844_v27 = vunpack.c.l.bf16 %v3951_v51 }
 0x399   : > { %3531 = vmatmul.msk.bf16.gmra.mxu1 %vm847_vm9, %v2129_v11 }
 0x39a   : > { %vm3025_vm1 = vcmp.ge.f32.partialorder %v3009_v21, 0.0  ;;  %v3041_v37 = vmul.f32 0.1, %v3009_v21  ;;  %v2511_v5 = vpop.f32.mrf.mxu2 }
 0x39b   : > { %v2639_v47 = vpop.f32.mrf.mxu3  ;;  %v4931_v54 = vpop.f32.mrf.mxu0 }
 0x39c   : > { %v3057_v7 = vsel %vm3025_vm1, %v3009_v21, %v3041_v37  ;;  %v2685_v1 = vadd.f32 %v2639_v47, %v2555_v58 }
 0x39d   : > { %v3083_v8 = vadd.f32 %v3840_v60, %v3057_v7 }
 0x39e   : > { %v2991_v18 = vadd.f32 %v4860_v43, %v2685_v1  ;;  %v2193_v52 = vpop.f32.mrf.mxu1  ;;  %v2581_v43 = vpack.c.b16 %v4905_v3, %v3833_v25  ;;  %v3845_v1 = vunpack.c.h.bf16 %v3951_v51 }
 0x39f   : > { %3621 = vst.msk [vmem:[%s4342_s18 + $0x10] sm:$0xff] %vm486_vm7, %v3083_v8  ;;  %3544 = vmatmul.msk.bf16.gmra.mxu2 %vm847_vm9, %v2451_v38  ;;  %v2235_v59 = vadd.f32 %v2193_v52, %v1929_v44 }
 0x3a0   : > { %v3010_v29 = vadd.f32 %v4872_v26, %v2991_v18 }
 0x3a2   : > { %vm3026_vm2 = vcmp.ge.f32.partialorder %v3010_v29, 0.0  ;;  %v3042_v30 = vmul.f32 0.1, %v3010_v29  ;;  %v2513_v19 = vpop.f32.mrf.mxu2 }
 0x3a3   : > { %v2641_v20 = vpop.f32.mrf.mxu3  ;;  %v2960_v9 = vpop.f32.mrf.mxu0  ;;  %v2556_v63 = vadd.f32 %v2513_v19, %v2234_v0 }
 0x3a4   : > { %v3058_v36 = vsel %vm3026_vm2, %v3010_v29, %v3042_v30 }
 0x3a5   : > { %v3084_v56 = vadd.f32 %v3841_v31, %v3058_v36  ;;  %v1930_v31 = vadd.f32 %v4712_v41, %v4762_v12 }
 0x3a6   : > { %v2196_v22 = vpop.f32.mrf.mxu1 }
 0x3a7   : > { %3622 = vst.msk [vmem:[%s4342_s18 + $0x18] sm:$0xff] %vm486_vm7, %v3084_v56  ;;  %v1931_v56 = vadd.f32 %v4725_v24, %v4769_v33  ;;  %v3952_v22 = vld [vmem:[%s4337_s14 + $0x18] sm:$0xff]  }
 0x3a8   : > { %3557 = vmatmul.msk.bf16.gmra.mxu3 %vm847_vm9, %v2581_v43  ;;  %v3848_v12 = vunpack.c.l.bf16 %v3952_v22 }
 0x3aa   : > { %v2515_v16 = vpop.f32.mrf.mxu2 }
 0x3ab   : > { %v2643_v53 = vpop.f32.mrf.mxu3  ;;  %v4946_v46 = vpop.f32.mrf.mxu0  ;;  %v2557_v11 = vadd.f32 %v2515_v16, %v2235_v59 }
 0x3ac   : > { %v2686_v57 = vadd.f32 %v2643_v53, %v2556_v63 }
 0x3ae   : > { %v2992_v3 = vadd.f32 %v4874_v49, %v2686_v57  ;;  %v2197_v42 = vpop.f32.mrf.mxu1 }
 0x3b0   : > { %v3011_v21 = vadd.f32 %v4872_v26, %v2992_v3 }
 0x3b2   : > { %vm3027_vm9 = vcmp.ge.f32.partialorder %v3011_v21, 0.0  ;;  %v3043_v14 = vmul.f32 0.1, %v3011_v21  ;;  %v2518_v60 = vpop.f32.mrf.mxu2 }
 0x3b3   : > { %v2645_v58 = vpop.f32.mrf.mxu3  ;;  %v4953_v47 = vpop.f32.mrf.mxu0 }
 0x3b4   : > { %v3059_v37 = vsel %vm3027_vm9, %v3011_v21, %v3043_v14  ;;  %v2687_v5 = vadd.f32 %v2645_v58, %v2557_v11  ;;  %v3849_v21 = vunpack.c.h.bf16 %v3952_v22 }
 0x3b5   : > { %v3092_v4 = vadd.f32 %v3844_v27, %v3059_v37 }
 0x3b6   : > { %v2993_v10 = vadd.f32 %v4895_v55, %v2687_v5  ;;  %v2200_v49 = vpop.f32.mrf.mxu1  ;;  %v2236_v55 = vadd.f32 %v2197_v42, %v1930_v31  ;;  %v1932_v5 = vadd.f32 %v4741_v23, %v4782_v28 }
 0x3b7   : > { %3625 = vst.msk [vmem:[%s4342_s18 + $0x20] sm:$0xff] %vm486_vm7, %v3092_v4  ;;  %v2237_v63 = vadd.f32 %v2200_v49, %v1931_v56 }
 0x3b8   : > { %v3012_v7 = vadd.f32 %v4872_v26, %v2993_v10 }
 0x3ba   : > { %vm3028_vm3 = vcmp.ge.f32.partialorder %v3012_v7, 0.0  ;;  %v3044_v38 = vmul.f32 0.1, %v3012_v7  ;;  %v2519_v8 = vpop.f32.mrf.mxu2 }
 0x3bb   : > { %v2648_v18 = vpop.f32.mrf.mxu3  ;;  %v2967_v29 = vpop.f32.mrf.mxu0  ;;  %v2558_v19 = vadd.f32 %v2519_v8, %v2236_v55 }
 0x3bc   : > { %v3060_v52 = vsel %vm3028_vm3, %v3012_v7, %v3044_v38  ;;  %v1933_v38 = vadd.f32 %v4751_v40, %v4790_v61  ;;  %v3953_v18 = vld [vmem:[%s4337_s14 + $0x20] sm:$0xff]  }
 0x3bd   : > { %v3093_v25 = vadd.f32 %v3845_v1, %v3060_v52  ;;  %v3852_v23 = vunpack.c.l.bf16 %v3953_v18 }
 0x3be   : > { %v2202_v30 = vpop.f32.mrf.mxu1 }
 0x3bf   : > { %3626 = vst.msk [vmem:[%s4342_s18 + $0x28] sm:$0xff] %vm486_vm7, %v3093_v25 }
 0x3c2   : > { %v2522_v20 = vpop.f32.mrf.mxu2 }
 0x3c3   : > { %v2649_v36 = vpop.f32.mrf.mxu3  ;;  %v4963_v43 = vpop.f32.mrf.mxu0  ;;  %v2559_v16 = vadd.f32 %v2522_v20, %v2237_v63 }
 0x3c4   : > { %v2688_v9 = vadd.f32 %v2649_v36, %v2558_v19 }
 0x3c6   : > { %v2994_v50 = vadd.f32 %v4920_v35, %v2688_v9  ;;  %v2204_v0 = vpop.f32.mrf.mxu1  ;;  %v3853_v9 = vunpack.c.h.bf16 %v3953_v18 }
 0x3c8   : > { %v3013_v41 = vadd.f32 %v4872_v26, %v2994_v50 }
 0x3ca   : > { %vm3029_vm4 = vcmp.ge.f32.partialorder %v3013_v41, 0.0  ;;  %v3045_v53 = vmul.f32 0.1, %v3013_v41  ;;  %v2524_v57 = vpop.f32.mrf.mxu2 }
 0x3cb   : > { %v2652_v44 = vpop.f32.mrf.mxu3  ;;  %v4970_v42 = vpop.f32.mrf.mxu0 }
 0x3cc   : > { %v3061_v3 = vsel %vm3029_vm4, %v3013_v41, %v3045_v53  ;;  %v2689_v51 = vadd.f32 %v2652_v44, %v2559_v16  ;;  %v1934_v41 = vadd.f32 %v4764_v48, %v4803_v45 }
 0x3cd   : > { %v3101_v24 = vadd.f32 %v3848_v12, %v3061_v3 }
 0x3ce   : > { %v2995_v33 = vadd.f32 %v4931_v54, %v2689_v51  ;;  %v2206_v35 = vpop.f32.mrf.mxu1  ;;  %v2238_v54 = vadd.f32 %v2204_v0, %v1932_v5  ;;  %v1935_v51 = vadd.f32 %v4771_v32, %v4810_v15 }
 0x3cf   : > { %3629 = vst.msk [vmem:[%s4342_s18 + $0x30] sm:$0xff] %vm486_vm7, %v3101_v24  ;;  %v2239_v29 = vadd.f32 %v2206_v35, %v1933_v38 }
 0x3d0   : > { %v3014_v59 = vadd.f32 %v4872_v26, %v2995_v33  ;;  %v3954_v33 = vld [vmem:[%s4337_s14 + $0x28] sm:$0xff]  }
 0x3d1   : > { %v3856_v45 = vunpack.c.l.bf16 %v3954_v33 }
 0x3d2   : > { %vm3030_vm5 = vcmp.ge.f32.partialorder %v3014_v59, 0.0  ;;  %v3046_v27 = vmul.f32 0.1, %v3014_v59  ;;  %v2526_v11 = vpop.f32.mrf.mxu2 }
 0x3d3   : > { %v2654_v14 = vpop.f32.mrf.mxu3  ;;  %v2973_v58 = vpop.f32.mrf.mxu0  ;;  %v2560_v10 = vadd.f32 %v2526_v11, %v2238_v54 }
 0x3d4   : > { %v3062_v60 = vsel %vm3030_vm5, %v3014_v59, %v3046_v27 }
 0x3d5   : > { %v3102_v37 = vadd.f32 %v3849_v21, %v3062_v60 }
 0x3d6   : > { %v2209_v4 = vpop.f32.mrf.mxu1 }
 0x3d7   : > { %3630 = vst.msk [vmem:[%s4342_s18 + $0x38] sm:$0xff] %vm486_vm7, %v3102_v37  ;;  %v3857_v4 = vunpack.c.h.bf16 %v3954_v33 }
 0x3da   : > { %v2528_v49 = vpop.f32.mrf.mxu2 }
 0x3db   : > { %v2656_v7 = vpop.f32.mrf.mxu3  ;;  %v2561_v28 = vadd.f32 %v2528_v49, %v2239_v29  ;;  %v2975_v16 = vpop.f32.mrf.mxu0 }
 0x3dc   : > { %v2690_v1 = vadd.f32 %v2656_v7, %v2560_v10 }
 0x3de   : > { %v2996_v8 = vadd.f32 %v4946_v46, %v2690_v1  ;;  %v2210_v52 = vpop.f32.mrf.mxu1 }
 0x3e0   : > { %v3015_v25 = vadd.f32 %v4872_v26, %v2996_v8  ;;  %v1936_v8 = vadd.f32 %v4784_v62, %v4823_v13 }
 0x3e2   : > { %vm3031_vm6 = vcmp.ge.f32.partialorder %v3015_v25, 0.0  ;;  %v3047_v31 = vmul.f32 0.1, %v3015_v25  ;;  %v2531_v30 = vpop.f32.mrf.mxu2 }
 0x3e3   : > { %v2658_v55 = vpop.f32.mrf.mxu3  ;;  %v2977_v14 = vpop.f32.mrf.mxu0 }
 0x3e4   : > { %v3063_v19 = vsel %vm3031_vm6, %v3015_v25, %v3047_v31  ;;  %v2691_v20 = vadd.f32 %v2658_v55, %v2561_v28  ;;  %v1937_v31 = vadd.f32 %v4792_v6, %v4833_v39  ;;  %v3955_v55 = vld [vmem:[%s4337_s14 + $0x30] sm:$0xff]  }
 0x3e5   : > { %v3110_v36 = vadd.f32 %v3852_v23, %v3063_v19  ;;  %v3860_v62 = vunpack.c.l.bf16 %v3955_v55 }
 0x3e6   : > { %v2997_v40 = vadd.f32 %v4953_v47, %v2691_v20  ;;  %v2213_v61 = vpop.f32.mrf.mxu1  ;;  %v2240_v47 = vadd.f32 %v2210_v52, %v1934_v41 }
 0x3e7   : > { %3633 = vst.msk [vmem:[%s4342_s18 + $0x40] sm:$0xff] %vm486_vm7, %v3110_v36  ;;  %v2241_v59 = vadd.f32 %v2213_v61, %v1935_v51 }
 0x3e8   : > { %v3016_v46 = vadd.f32 %v4872_v26, %v2997_v40 }
 0x3ea   : > { %vm3032_vm10 = vcmp.ge.f32.partialorder %v3016_v46, 0.0  ;;  %v3048_v56 = vmul.f32 0.1, %v3016_v46  ;;  %v2532_v50 = vpop.f32.mrf.mxu2 }
 0x3eb   : > { %v2661_v22 = vpop.f32.mrf.mxu3  ;;  %v2562_v53 = vadd.f32 %v2532_v50, %v2240_v47 }
 0x3ec   : > { %v3064_v0 = vsel %vm3032_vm10, %v3016_v46, %v3048_v56 }
 0x3ed   : > { %v3111_v63 = vadd.f32 %v3853_v9, %v3064_v0 }
 0x3ee   : > { %v2215_v12 = vpop.f32.mrf.mxu1 }
 0x3ef   : > { %3634 = vst.msk [vmem:[%s4342_s18 + $0x48] sm:$0xff] %vm486_vm7, %v3111_v63  ;;  %v3861_v63 = vunpack.c.h.bf16 %v3955_v55 }
 0x3f2   : > { %v2535_v57 = vpop.f32.mrf.mxu2 }
 0x3f3   : > { %v2662_v44 = vpop.f32.mrf.mxu3  ;;  %v2563_v21 = vadd.f32 %v2535_v57, %v2241_v59 }
 0x3f4   : > { %v2692_v3 = vadd.f32 %v2662_v44, %v2562_v53  ;;  %v1938_v44 = vadd.f32 %v4805_v17, %v4851_v2 }
 0x3f6   : > { %v2998_v24 = vadd.f32 %v4963_v43, %v2692_v3  ;;  %v2217_v35 = vpop.f32.mrf.mxu1 }
 0x3f8   : > { %v3017_v48 = vadd.f32 %v4872_v26, %v2998_v24 }
 0x3fa   : > { %vm3033_vm11 = vcmp.ge.f32.partialorder %v3017_v48, 0.0  ;;  %v3049_v27 = vmul.f32 0.1, %v3017_v48  ;;  %v2537_v11 = vpop.f32.mrf.mxu2 }
 0x3fb   : > { %v2665_v60 = vpop.f32.mrf.mxu3 }
 0x3fc   : > { %v3065_v58 = vsel %vm3033_vm11, %v3017_v48, %v3049_v27  ;;  %v2693_v37 = vadd.f32 %v2665_v60, %v2563_v21  ;;  %v5050_v48 = vld [vmem:[#allocation3_spill] sm:$0xff]  ;;  %v3956_v27 = vld [vmem:[%s4337_s14 + $0x38] sm:$0xff]  }
 0x3fd   : > { %v3119_v5 = vadd.f32 %v3856_v45, %v3065_v58  ;;  %v2980_v7 = vpop.f32.mrf.mxu0  ;;  %v1939_v45 = vadd.f32 %v5050_v48, %v4858_v34  ;;  %v3864_v60 = vunpack.c.l.bf16 %v3956_v27 }
 0x3fe   : > { %v2999_v32 = vadd.f32 %v4970_v42, %v2693_v37  ;;  %v2219_v15 = vpop.f32.mrf.mxu1  ;;  %v2242_v42 = vadd.f32 %v2217_v35, %v1936_v8 }
 0x3ff   : > { %3637 = vst.msk [vmem:[%s4342_s18 + $0x50] sm:$0xff] %vm486_vm7, %v3119_v5  ;;  %v2243_v20 = vadd.f32 %v2219_v15, %v1937_v31 }
 0x400   : > { %v3018_v43 = vadd.f32 %v4872_v26, %v2999_v32 }
 0x402   : > { %vm3034_vm12 = vcmp.ge.f32.partialorder %v3018_v43, 0.0  ;;  %v3050_v54 = vmul.f32 0.1, %v3018_v43  ;;  %v2539_v10 = vpop.f32.mrf.mxu2 }
 0x403   : > { %v2667_v49 = vpop.f32.mrf.mxu3  ;;  %v2564_v52 = vadd.f32 %v2539_v10, %v2242_v42 }
 0x404   : > { %v3066_v1 = vsel %vm3034_vm12, %v3018_v43, %v3050_v54 }
 0x405   : > { %v3120_v38 = vadd.f32 %v3857_v4, %v3066_v1  ;;  %v2981_v23 = vpop.f32.mrf.mxu0  ;;  %v3865_v4 = vunpack.c.h.bf16 %v3956_v27 }
 0x406   : > { %v2222_v18 = vpop.f32.mrf.mxu1 }
 0x407   : > { %3638 = vst.msk [vmem:[%s4342_s18 + $0x58] sm:$0xff] %vm486_vm7, %v3120_v38 }
 0x40a   : > { %v2541_v29 = vpop.f32.mrf.mxu2 }
 0x40b   : > { %v2669_v25 = vpop.f32.mrf.mxu3  ;;  %v2565_v13 = vadd.f32 %v2541_v29, %v2243_v20 }
 0x40c   : > { %v2694_v28 = vadd.f32 %v2669_v25, %v2564_v52 }
 0x40d   : > { %v2984_v9 = vpop.f32.mrf.mxu0 }
 0x40e   : > { %v3000_v30 = vadd.f32 %v2975_v16, %v2694_v28  ;;  %v2223_v19 = vpop.f32.mrf.mxu1 }
 0x40f   : > { %v2244_v51 = vadd.f32 %v2223_v19, %v1938_v44 }
 0x410   : > { %v3019_v36 = vadd.f32 %v4872_v26, %v3000_v30 }
 0x412   : > { %vm3035_vm13 = vcmp.ge.f32.partialorder %v3019_v36, 0.0  ;;  %v3051_v40 = vmul.f32 0.1, %v3019_v36  ;;  %v2544_v61 = vpop.f32.mrf.mxu2 }
 0x413   : > { %v2671_v46 = vpop.f32.mrf.mxu3 }
 0x414   : > { %v3067_v56 = vsel %vm3035_vm13, %v3019_v36, %v3051_v40  ;;  %v2695_v50 = vadd.f32 %v2671_v46, %v2565_v13 }
 0x415   : > { %v3128_v22 = vadd.f32 %v3860_v62, %v3067_v56  ;;  %v2986_v16 = vpop.f32.mrf.mxu0 }
 0x416   : > { %v3001_v0 = vadd.f32 %v2977_v14, %v2695_v50  ;;  %v2226_v6 = vpop.f32.mrf.mxu1 }
 0x417   : > { %3641 = vst.msk [vmem:[%s4342_s18 + $0x60] sm:$0xff] %vm486_vm7, %v3128_v22  ;;  %v2245_v11 = vadd.f32 %v2226_v6, %v1939_v45 }
 0x418   : > { %v3020_v39 = vadd.f32 %v4872_v26, %v3001_v0 }
 0x41a   : > { %vm3036_vm0 = vcmp.ge.f32.partialorder %v3020_v39, 0.0  ;;  %v3052_v41 = vmul.f32 0.1, %v3020_v39  ;;  %v2545_v12 = vpop.f32.mrf.mxu2 }
 0x41b   : > { %v2674_v47 = vpop.f32.mrf.mxu3  ;;  %v2566_v24 = vadd.f32 %v2545_v12, %v2244_v51 }
 0x41c   : > { %v3068_v53 = vsel %vm3036_vm0, %v3020_v39, %v3052_v41 }
 0x41d   : > { %v3129_v57 = vadd.f32 %v3861_v63, %v3068_v53 }
 0x41e   : > { %v2228_v3 = vpop.f32.mrf.mxu1 }
 0x41f   : > { %3642 = vst.msk [vmem:[%s4342_s18 + $0x68] sm:$0xff] %vm486_vm7, %v3129_v57 }
 0x422   : > { %v2548_v33 = vpop.f32.mrf.mxu2 }
 0x423   : > { %v2675_v35 = vpop.f32.mrf.mxu3  ;;  %v2567_v58 = vadd.f32 %v2548_v33, %v2245_v11 }
 0x424   : > { %v2696_v59 = vadd.f32 %v2675_v35, %v2566_v24 }
 0x426   : > { %v3002_v21 = vadd.f32 %v2981_v23, %v2696_v59 }
 0x428   : > { %v3021_v14 = vadd.f32 %v4872_v26, %v3002_v21 }
 0x42a   : > { %vm3037_vm8 = vcmp.ge.f32.partialorder %v3021_v14, 0.0  ;;  %v3053_v17 = vmul.f32 0.1, %v3021_v14  ;;  %v2550_v2 = vpop.f32.mrf.mxu2 }
 0x42b   : > { %v2678_v37 = vpop.f32.mrf.mxu3 }
 0x42c   : > { %v3069_v5 = vsel %vm3037_vm8, %v3021_v14, %v3053_v17  ;;  %v2697_v32 = vadd.f32 %v2678_v37, %v2567_v58 }
 0x42d   : > { %v3137_v15 = vadd.f32 %v3864_v60, %v3069_v5 }
 0x42e   : > { %v3003_v43 = vadd.f32 %v2984_v9, %v2697_v32 }
 0x42f   : > { %3645 = vst.msk [vmem:[%s4342_s18 + $0x70] sm:$0xff] %vm486_vm7, %v3137_v15 }
 0x430   : > { %v3022_v34 = vadd.f32 %v4872_v26, %v3003_v43 }
 0x432   : > { %vm3038_vm14 = vcmp.ge.f32.partialorder %v3022_v34, 0.0  ;;  %v3054_v54 = vmul.f32 0.1, %v3022_v34 }
 0x433   : > { %v2680_v10 = vpop.f32.mrf.mxu3 }
 0x434   : > { %v3070_v49 = vsel %vm3038_vm14, %v3022_v34, %v3054_v54 }
 0x435   : > { %v3138_v7 = vadd.f32 %v3865_v4, %v3070_v49 }
 0x437   : > { %3646 = vst.msk [vmem:[%s4342_s18 + $0x78] sm:$0xff] %vm486_vm7, %v3138_v7 }
 0x438 PF: > { %s16_s25 = sadd.s32 1, %s4211_s25   ;;  %s5051_s21 = smov %s4203_s23 }
 0x439   : > { %p13_p10 = scmp.ge.s32.totalorder %s16_s25, 6   ;;  %s5052_s22 = smov %s4207_s24 }
 0x43a   : > { %s5053_s23 = smov %s5056_s26  ;;  %s5054_s24 = smov %s5060_s27 }
 0x43b   :  { %15 = sbr.rel (!%p13_p10) target bundleno = 3 (0x3), region = 108 }

</bundles_post_ra>
